<compile_context>
chip_gen: v7x
topology: tpu7x:2x2x1
jax: 0.10.0
libtpu: 0.0.40
codegen_flags: <defaults>
</compile_context>

<pallas_src>
import functools

import jax
import jax.numpy as jnp
from jax.experimental import pallas as pl
from jax.experimental.pallas import tpu as pltpu


def _round_up(n, m):
    return ((n + m - 1) // m) * m


def _pos2weight_kernel(x_ref, w1_ref, b1_ref, w2_ref, b2_ref, w3_ref, b3_ref,
                       o_ref, *, layer1_on_mxu):
    """Full 3-layer MLP (Linear->ReLU->Linear->ReLU->Linear) for one row tile."""
    if layer1_on_mxu:
        # v6e/v7x: kernel is VALU-bound; the MXU has slack, so run the K=8
        # (zero-padded) layer-1 matmul there and keep epilogues in packed bf16.
        h1 = jnp.dot(x_ref[...], w1_ref[...],
                     preferred_element_type=jnp.float32)            # (Tm, 256) f32
        h1 = jnp.maximum(h1.astype(jnp.bfloat16) + b1_ref[...], 0.0)  # bf16
    else:
        # v5e: MXU-bound; K=3 layer 1 stays on the VPU (hides under MXU slack),
        # epilogues stay f32 (no bf16 VPU path on this generation).
        x = x_ref[...]                                   # (Tm, 3)   f32
        w1 = w1_ref[...]                                 # (3, 256)  f32
        h1 = (x[:, 0:1] * w1[0:1, :]
              + x[:, 1:2] * w1[1:2, :]
              + x[:, 2:3] * w1[2:3, :]
              + b1_ref[...])
        h1 = jnp.maximum(h1, 0.0).astype(jnp.bfloat16)   # (Tm, 256) bf16

    # ---- Layer 2 on the MXU: bf16 operands, f32 accumulate -----------------
    h2 = jnp.dot(h1, w2_ref[...], preferred_element_type=jnp.float32)
    if layer1_on_mxu:
        h2 = jnp.maximum(h2.astype(jnp.bfloat16) + b2_ref[...], 0.0)   # bf16
    else:
        h2 = jnp.maximum(h2 + b2_ref[...], 0.0).astype(jnp.bfloat16)   # f32 epi

    # ---- Layer 3 on the MXU: bf16 operands, f32 accumulate; f32 final bias --
    out = jnp.dot(h2, w3_ref[...], preferred_element_type=jnp.float32)
    out = out + b3_ref[...]                               # (Tm, out_f_pad) f32
    o_ref[...] = out.astype(o_ref.dtype)


def _default_layer1_on_mxu():
    """v5e is MXU-bound here -> keep layer 1 on the VPU; everywhere else MXU."""
    try:
        kind = jax.devices()[0].device_kind.lower()
    except Exception:
        return True
    return not any(t in kind for t in ("v5 lite", "v5e", "v5litepod"))


def pos2weight_forward(x, params, *, tm=2048, layer1_on_mxu=None):
    """x: (N, 3) float32; params: dict of w1,b1,w2,b2,w3,b3 (float32)."""
    if layer1_on_mxu is None:
        layer1_on_mxu = _default_layer1_on_mxu()

    w1, b1 = params["w1"], params["b1"]
    w2, b2 = params["w2"], params["b2"]
    w3, b3 = params["w3"], params["b3"]

    N, in_f = x.shape
    h1_f = w1.shape[1]
    h2_f = w2.shape[1]
    out_f = w3.shape[1]

    # --- pad output features to a multiple of 128 (lane-dense stores) -------
    out_f_pad = _round_up(out_f, 128)
    if out_f_pad != out_f:
        w3 = jnp.pad(w3, ((0, 0), (0, out_f_pad - out_f)))
        b3 = jnp.pad(b3, (0, out_f_pad - out_f))

    # --- row tile: big tile to amortize per-grid-step overhead --------------
    tm = min(tm, _round_up(max(N, 8), 8))          # shrink tile for tiny inputs
    if N > 8 and _round_up(N, tm) // tm < 2:
        # Ensure >=2 grid steps so both TensorCores get work on v7x megacore.
        tm = max(8, _round_up(N, 16) // 2)
    n_pad = _round_up(N, tm)
    grid = (n_pad // tm,)

    # --- operand prep --------------------------------------------------------
    if layer1_on_mxu:
        in_f_k = 8                                  # K padded for the MXU / sublanes
        x_p = jnp.zeros((n_pad, in_f_k), jnp.bfloat16)
        x_p = x_p.at[:N, :in_f].set(x.astype(jnp.bfloat16))
        w1_k = jnp.zeros((in_f_k, h1_f), jnp.bfloat16)
        w1_k = w1_k.at[:in_f, :].set(w1.astype(jnp.bfloat16))
        b1_2d = b1.reshape(1, h1_f).astype(jnp.bfloat16)
        b2_2d = b2.reshape(1, h2_f).astype(jnp.bfloat16)
    else:
        in_f_k = in_f
        x_p = jnp.pad(x, ((0, n_pad - N), (0, 0))) if n_pad != N else x
        w1_k = w1.astype(jnp.float32)
        b1_2d = b1.reshape(1, h1_f).astype(jnp.float32)
        b2_2d = b2.reshape(1, h2_f).astype(jnp.float32)

    # bf16 weights for the MXU layers (accumulation stays f32 in-kernel).
    w2_bf = w2.astype(jnp.bfloat16)
    w3_bf = w3.astype(jnp.bfloat16)
    b3_2d = b3.reshape(1, out_f_pad).astype(jnp.float32)

    full = lambda i: (0, 0)   # grid-invariant weights/biases: no re-DMA

    # Advisory cost estimate for XLA's scheduler.
    flops = 2 * N * (in_f * h1_f + h1_f * h2_f + h2_f * out_f)
    bytes_accessed = int(
        x_p.size * jnp.dtype(x_p.dtype).itemsize
        + w1_k.size * jnp.dtype(w1_k.dtype).itemsize
        + w2_bf.size * 2 + w3_bf.size * 2
        + (h1_f + h2_f + out_f_pad) * 4
        + n_pad * out_f_pad * 4)
    cost = pl.CostEstimate(flops=flops, transcendentals=0,
                           bytes_accessed=bytes_accessed)

    kernel = functools.partial(_pos2weight_kernel, layer1_on_mxu=layer1_on_mxu)

    out = pl.pallas_call(
        kernel,
        out_shape=jax.ShapeDtypeStruct((n_pad, out_f_pad), x.dtype),
        grid_spec=pltpu.PrefetchScalarGridSpec(
            num_scalar_prefetch=0,
            grid=grid,
            in_specs=[
                pl.BlockSpec((tm, in_f_k), lambda i: (i, 0)),   # x tile
                pl.BlockSpec((in_f_k, h1_f), full),             # W1
                pl.BlockSpec((1, h1_f), full),                  # b1
                pl.BlockSpec((h1_f, h2_f), full),               # W2 (256,512) bf16
                pl.BlockSpec((1, h2_f), full),                  # b2
                pl.BlockSpec((h2_f, out_f_pad), full),          # W3 (512,128) bf16
                pl.BlockSpec((1, out_f_pad), full),             # b3
            ],
            out_specs=pl.BlockSpec((tm, out_f_pad), lambda i: (i, 0)),
        ),
        compiler_params=pltpu.CompilerParams(
            dimension_semantics=("parallel",),   # shards row tiles across TCs
            vmem_limit_bytes=32 << 20,           # ~14 MiB actual need at tm=2048
        ),
        cost_estimate=cost,
    )(x_p, w1_k, b1_2d, w2_bf, b2_2d, w3_bf, b3_2d)

    # strip row + lane padding
    return out[:N, :out_f]


def init_params(key, inC=4, kernel_size=3, outC=3, dtype=jnp.float32):
    """Deterministic synthetic init (PyTorch-Linear-like uniform bounds)."""
    out_f = kernel_size * kernel_size * inC * outC  # 3*3*4*3 = 108
    dims = [(3, 256), (256, 512), (512, out_f)]
    params = {}
    for idx, (fin, fout) in enumerate(dims, start=1):
        key, kw, kb = jax.random.split(key, 3)
        bound = 1.0 / (fin ** 0.5)
        params[f"w{idx}"] = jax.random.uniform(
            kw, (fin, fout), dtype, minval=-bound, maxval=bound)
        params[f"b{idx}"] = jax.random.uniform(
            kb, (fout,), dtype, minval=-bound, maxval=bound)
    return params


def _reference(x, params):
    h1 = jnp.maximum(x @ params["w1"] + params["b1"], 0.0)
    h2 = jnp.maximum(h1 @ params["w2"] + params["b2"], 0.0)
    return h2 @ params["w3"] + params["b3"]


if __name__ == "__main__":
    key = jax.random.PRNGKey(0)
    kx, kp = jax.random.split(key)

    inC, kernel_size, outC = 4, 3, 3
    # N = number of position vectors (rows of x); deliberately not a multiple
    # of 8/128/tm to exercise the wrapper-side padding + tile-splitting path.
    N = 300
    x = jax.random.normal(kx, (N, 3), dtype=jnp.float32)

    params = init_params(kp, inC=inC, kernel_size=kernel_size, outC=outC)

    out = pos2weight_forward(x, params, tm=2048)
    out = jax.block_until_ready(out)

    ref = _reference(x, params)
    assert out.shape == (N, kernel_size * kernel_size * inC * outC)
    # bf16 MXU operands + bf16 epilogues (f32 accumulation) -> relaxed tolerance.
    assert jnp.allclose(out, ref, atol=2e-2, rtol=5e-2), "mismatch vs reference"

    print("KERNEL_OK")
</pallas_src>

<mosaic_0001>
module attributes {stable_mosaic.version = 11 : i64} {
  func.func @_pos2weight_kernel(%arg0: i32, %arg1: memref<152x8xbf16, #tpu.memory_space<vmem>>, %arg2: memref<8x256xbf16, #tpu.memory_space<vmem>>, %arg3: memref<1x256xbf16, #tpu.memory_space<vmem>>, %arg4: memref<256x512xbf16, #tpu.memory_space<vmem>>, %arg5: memref<1x512xbf16, #tpu.memory_space<vmem>>, %arg6: memref<512x128xbf16, #tpu.memory_space<vmem>>, %arg7: memref<1x128xf32, #tpu.memory_space<vmem>>, %arg8: memref<152x128xf32, #tpu.memory_space<vmem>>) attributes {dimension_semantics = [#tpu.dimension_semantics<parallel>], iteration_bounds = array<i64: 2>, scalar_prefetch = 0 : i64, scratch_operands = 0 : i64, tpu.core_type = #tpu.core_type<tc>, window_params = [{transform_indices = @transform_0, window_bounds = array<i64: 152, 8>}, {pipeline_mode = #tpu.pipeline_mode<synchronous>, transform_indices = @transform_1, window_bounds = array<i64: 8, 256>}, {pipeline_mode = #tpu.pipeline_mode<synchronous>, transform_indices = @transform_2, window_bounds = array<i64: 1, 256>}, {pipeline_mode = #tpu.pipeline_mode<synchronous>, transform_indices = @transform_3, window_bounds = array<i64: 256, 512>}, {pipeline_mode = #tpu.pipeline_mode<synchronous>, transform_indices = @transform_4, window_bounds = array<i64: 1, 512>}, {pipeline_mode = #tpu.pipeline_mode<synchronous>, transform_indices = @transform_5, window_bounds = array<i64: 512, 128>}, {pipeline_mode = #tpu.pipeline_mode<synchronous>, transform_indices = @transform_6, window_bounds = array<i64: 1, 128>}, {transform_indices = @transform_7, window_bounds = array<i64: 152, 128>}]} {
    %c0 = arith.constant 0 : index
    %c0_0 = arith.constant 0 : index
    %0 = vector.load %arg1[%c0, %c0_0] : memref<152x8xbf16, #tpu.memory_space<vmem>>, vector<152x8xbf16>
    %c0_1 = arith.constant 0 : index
    %c0_2 = arith.constant 0 : index
    %1 = vector.load %arg2[%c0_1, %c0_2] : memref<8x256xbf16, #tpu.memory_space<vmem>>, vector<8x256xbf16>
    %cst = arith.constant dense<0.000000e+00> : vector<152x256xf32>
    %2 = tpu.matmul %0, %1, %cst {dimension_numbers = #tpu.dot_dimension_numbers<[1], [0], [0], [1], [0, 0, 1, 1], [], []>} : vector<152x8xbf16>, vector<8x256xbf16>, vector<152x256xf32> -> vector<152x256xf32>
    %3 = arith.truncf %2 : vector<152x256xf32> to vector<152x256xbf16>
    %c0_3 = arith.constant 0 : index
    %c0_4 = arith.constant 0 : index
    %4 = vector.load %arg3[%c0_3, %c0_4] : memref<1x256xbf16, #tpu.memory_space<vmem>>, vector<1x256xbf16>
    %5 = vector.broadcast %4 : vector<1x256xbf16> to vector<152x256xbf16>
    %6 = arith.addf %3, %5 : vector<152x256xbf16>
    %cst_5 = arith.constant 0.000000e+00 : bf16
    %7 = vector.broadcast %cst_5 : bf16 to vector<152x256xbf16>
    %8 = arith.maximumf %6, %7 : vector<152x256xbf16>
    %c0_6 = arith.constant 0 : index
    %c0_7 = arith.constant 0 : index
    %9 = vector.load %arg4[%c0_6, %c0_7] : memref<256x512xbf16, #tpu.memory_space<vmem>>, vector<256x512xbf16>
    %cst_8 = arith.constant dense<0.000000e+00> : vector<152x512xf32>
    %10 = tpu.matmul %8, %9, %cst_8 {dimension_numbers = #tpu.dot_dimension_numbers<[1], [0], [0], [1], [0, 0, 1, 1], [], []>} : vector<152x256xbf16>, vector<256x512xbf16>, vector<152x512xf32> -> vector<152x512xf32>
    %11 = arith.truncf %10 : vector<152x512xf32> to vector<152x512xbf16>
    %c0_9 = arith.constant 0 : index
    %c0_10 = arith.constant 0 : index
    %12 = vector.load %arg5[%c0_9, %c0_10] : memref<1x512xbf16, #tpu.memory_space<vmem>>, vector<1x512xbf16>
    %13 = vector.broadcast %12 : vector<1x512xbf16> to vector<152x512xbf16>
    %14 = arith.addf %11, %13 : vector<152x512xbf16>
    %cst_11 = arith.constant 0.000000e+00 : bf16
    %15 = vector.broadcast %cst_11 : bf16 to vector<152x512xbf16>
    %16 = arith.maximumf %14, %15 : vector<152x512xbf16>
    %c0_12 = arith.constant 0 : index
    %c0_13 = arith.constant 0 : index
    %17 = vector.load %arg6[%c0_12, %c0_13] : memref<512x128xbf16, #tpu.memory_space<vmem>>, vector<512x128xbf16>
    %cst_14 = arith.constant dense<0.000000e+00> : vector<152x128xf32>
    %18 = tpu.matmul %16, %17, %cst_14 {dimension_numbers = #tpu.dot_dimension_numbers<[1], [0], [0], [1], [0, 0, 1, 1], [], []>} : vector<152x512xbf16>, vector<512x128xbf16>, vector<152x128xf32> -> vector<152x128xf32>
    %c0_15 = arith.constant 0 : index
    %c0_16 = arith.constant 0 : index
    %19 = vector.load %arg7[%c0_15, %c0_16] : memref<1x128xf32, #tpu.memory_space<vmem>>, vector<1x128xf32>
    %20 = vector.broadcast %19 : vector<1x128xf32> to vector<152x128xf32>
    %21 = arith.addf %18, %20 : vector<152x128xf32>
    %c0_17 = arith.constant 0 : index
    %c0_18 = arith.constant 0 : index
    %22 = vector.load %arg8[%c0_17, %c0_18] : memref<152x128xf32, #tpu.memory_space<vmem>>, vector<152x128xf32>
    tpu.vector_store %arg8[%c0_17, %c0_18], %21 {strides = array<i32>} : memref<152x128xf32, #tpu.memory_space<vmem>>, vector<152x128xf32>,
    return
  }
  func.func @transform_0(%arg0: i32) -> (i32, i32) {
    %c0_i32 = arith.constant 0 : i32
    %c0_i32_0 = arith.constant 0 : i32
    return %arg0, %c0_i32 : i32, i32
  }
  func.func @transform_1(%arg0: i32) -> (i32, i32) {
    %c0_i32 = arith.constant 0 : i32
    %c0_i32_0 = arith.constant 0 : i32
    %c0_i32_1 = arith.constant 0 : i32
    return %c0_i32, %c0_i32_0 : i32, i32
  }
  func.func @transform_2(%arg0: i32) -> (i32, i32) {
    %c0_i32 = arith.constant 0 : i32
    %c0_i32_0 = arith.constant 0 : i32
    %c0_i32_1 = arith.constant 0 : i32
    return %c0_i32, %c0_i32_0 : i32, i32
  }
  func.func @transform_3(%arg0: i32) -> (i32, i32) {
    %c0_i32 = arith.constant 0 : i32
    %c0_i32_0 = arith.constant 0 : i32
    %c0_i32_1 = arith.constant 0 : i32
    return %c0_i32, %c0_i32_0 : i32, i32
  }
  func.func @transform_4(%arg0: i32) -> (i32, i32) {
    %c0_i32 = arith.constant 0 : i32
    %c0_i32_0 = arith.constant 0 : i32
    %c0_i32_1 = arith.constant 0 : i32
    return %c0_i32, %c0_i32_0 : i32, i32
  }
  func.func @transform_5(%arg0: i32) -> (i32, i32) {
    %c0_i32 = arith.constant 0 : i32
    %c0_i32_0 = arith.constant 0 : i32
    %c0_i32_1 = arith.constant 0 : i32
    return %c0_i32, %c0_i32_0 : i32, i32
  }
  func.func @transform_6(%arg0: i32) -> (i32, i32) {
    %c0_i32 = arith.constant 0 : i32
    %c0_i32_0 = arith.constant 0 : i32
    %c0_i32_1 = arith.constant 0 : i32
    return %c0_i32, %c0_i32_0 : i32, i32
  }
  func.func @transform_7(%arg0: i32) -> (i32, i32) {
    %c0_i32 = arith.constant 0 : i32
    %c0_i32_0 = arith.constant 0 : i32
    return %arg0, %c0_i32 : i32, i32
  }
}

</mosaic_0001>

<bundles_post_ra>
// kernel: tpu_custom_call.1
= control target key start
LH: loop header
LB: loop body
LE: loop exit
PB: predicated region body
PF: predicated region fallthrough
CT: control target
= control target key end

     0   :  { %12 = vsyncpa [#allocation3], 0  ;;  %s3181_s0 = inlined_call_operand.vmem [shape: bf16[304,8], index: 0, kind: input, shape index: {}]   ;;  %s3182_s1 = inlined_call_operand.vmem [shape: bf16[8,256], index: 1, kind: input, shape index: {}]   ;;  %s3183_s2 = inlined_call_operand.vmem [shape: bf16[1,256], index: 2, kind: input, shape index: {}]   ;;  %s3184_s3 = inlined_call_operand.hbm [shape: bf16[256,512], index: 3, kind: input, shape index: {}]   ;;  %s3185_s4 = inlined_call_operand.vmem [shape: bf16[1,512], index: 4, kind: input, shape index: {}]   ;;  %s3186_s5 = inlined_call_operand.hbm [shape: bf16[512,128], index: 5, kind: input, shape index: {}]   ;;  %s3187_s6 = inlined_call_operand.vmem [shape: f32[1,128], index: 6, kind: input, shape index: {}]   ;;  %s3188_s7 = inlined_call_operand.hbm [shape: f32[304,128], index: 7, kind: output, shape index: {}]  }
   0x1   :  { %13 = vsyncpa [#allocation6], 0 }
   0x2   :  { %14 = vsyncpa [#allocation4], 0 }
   0x3   :  { %16 = vsyncpa [#allocation4 + $0x1], 0  ;;  %s2752_s24 = smov 0   ;;  %s2754_s25 = smov 0  }
   0x4   :  { %s2756_s26 = smov 0   ;;  %s2758_s27 = smov 0  }
   0x5 LB: > { %s2773_s28 = sadd.s32 4294967295, %s2699_s27   ;;  %s2075_s29 = sadd.s32 4294967294, %s2699_s27   ;;  %s2699_s27 = sphi %s2758_s27, %s3208_s27   ;;  %s2695_s26 = sphi %s2756_s26, %s3207_s26   ;;  %s2691_s25 = sphi %s2754_s25, %s3206_s25   ;;  %s2687_s24 = sphi %s2752_s24, %s3205_s24  }
   0x6   : > { %s2777_s30 = sadd.s32 1, %s2699_s27   ;;  %s181_s8 = sadd.s32 1, %s2695_s26 }
   0x7   : > { %s178_s9 = ssub.s32 %s2699_s27, %s2777_s30  ;;  %p191_p0 = scmp.ne.s32.totalorder %s2695_s26, %s2691_s25 }
   0x8   : > { %p179_p1 = scmp.eq.s32.totalorder %s178_s9, 0  ;;  %p192_p2 = scmp.eq.s32.totalorder %s2773_s28, 1 }
   0x9   : > { %p197_p3 = scmp.ne.s32.totalorder %s2691_s25, %s2687_s24  ;;  %p198_p4 = scmp.eq.s32.totalorder %s2075_s29, 1 }
   0xa   : > { %s2788_s10 = scalar_select %p179_p1, %s2695_s26, %s181_s8  }
   0xb   : > { %p2790_p5 = por %p192_p2, %p191_p0  ;;  %p2794_p6 = por %p198_p4, %p197_p3 }
   0xc   : > { %3192 = sst [smem:[#allocation11_spill]] %s2788_s10  ;;  %p2076_p7 = scmp.ge.s32.totalorder %s2699_s27, 1 }
   0xd   : > { %s3193_s11 = scalar_select %p2790_p5, 1, 0 }
   0xe   : > { %s3194_s12 = scalar_select %p2794_p6, 1, 0 }
   0xf   : > { %p205_p8 = scmp.lt.s32.totalorder %s2699_s27, 3  ;;  %p3189_p9 = scmp.eq.s32.totalorder %s2773_s28, 0 }
  0x10   : > { %s2701_s14 = smov [#allocation2]   ;;  %s2702_s17 = smov [#allocation5]  }
  0x11   : > { %p2801_p10 = pnand %p2076_p7, %p205_p8  ;;  %s223_s15 = sshll.u32 %s2701_s14, 4  ;;  %s224_s15 = int_to_ptr.vmem [resolvable:$true] %s223_s15 }
  0x12   : > { %s239_s18 = sshll.u32 %s2702_s17, 4  ;;  %s2573_s21 = scalar_lea.hbm %s3184_s3, 8192  ;;  %s2813_s18 = int_to_ptr.vmem [resolvable:$true] %s239_s18 }
  0x13   : > { %s3195_s13 = scalar_select %p2801_p10, 1, 0 }
  0x14   : > { %p2375_p11 = pneg %p2801_p10  ;;  %p2574_p13 = scmp.ne.s32.totalorder %s3184_s3, %s2573_s21 }
  0x15   : > { %p2580_p3 = scmp.lt.u32.totalorder %s2573_s21, %s3184_s3 }
  0x16   : > { %p2809_p12 = pnand %p3189_p9, %p2375_p11 }
  0x18   : > { %p2575_p0 = pneg %p2809_p12 }
  0x1a   : > { %p2576_p1 = pnand %p2575_p0, %p2574_p13 }
  0x1c   : > { %p2577_p2 = pneg %p2576_p1 }
  0x1e   : > { %p2582_p4 = pnand %p2580_p3, %p2577_p2 }
  0x20   : > { %2585 = shalt.err (!%p2582_p4)
}
  0x21   : > { %s2586_s9 = scalar_lea.vmem %s224_s15, 8192  ;;  %p2594_p9 = scmp.lt.s32.totalorder %s224_s15, %s224_s15 }
  0x22   : > { %p2587_p7 = scmp.ne.s32.totalorder %s224_s15, %s2586_s9  ;;  %p2595_p6 = scmp.lt.s32.totalorder %s2586_s9, %s2586_s9 }
  0x24   : > { %p2589_p8 = pnand %p2587_p7, %p2575_p0  ;;  %p2596_p5 = por %p2595_p6, %p2594_p9 }
  0x26   : > { %p2590_p11 = pneg %p2589_p8 }
  0x28   : > { %p2597_p10 = pnand %p2596_p5, %p2590_p11 }
  0x2a   : > { %2600 = shalt.err (!%p2597_p10)
}
  0x2b   : > { %s2703_s14 = smov 256   ;;  %s2704_s17 = smov 16  }
  0x2c   : > { %2378 = dma.hbm_to_vmem [thread:$0]  (!%p2809_p12), %s3184_s3, 8192, %s224_s15, [#allocation3], %s2703_s14, %s2703_s14, %s2704_s17  }
  0x2d   : > { %s2601_s23 = scalar_lea.hbm %s3186_s5, 4096 }
  0x2e   : > { %p2602_p13 = scmp.ne.s32.totalorder %s3186_s5, %s2601_s23  ;;  %p2608_p9 = scmp.lt.u32.totalorder %s2601_s23, %s3186_s5 }
  0x30   : > { %p2604_p5 = pnand %p2602_p13, %p2575_p0 }
  0x32   : > { %p2605_p6 = pneg %p2604_p5 }
  0x34   : > { %p2610_p10 = pnand %p2608_p9, %p2605_p6 }
  0x36   : > { %2613 = shalt.err (!%p2610_p10)
}
  0x37   : > { %s2614_s15 = scalar_lea.vmem %s2813_s18, 4096  ;;  %p2622_p4 = scmp.lt.s32.totalorder %s2813_s18, %s2813_s18 }
  0x38   : > { %p2615_p1 = scmp.ne.s32.totalorder %s2813_s18, %s2614_s15  ;;  %p2623_p7 = scmp.lt.s32.totalorder %s2614_s15, %s2614_s15 }
  0x3a   : > { %p2617_p2 = pnand %p2615_p1, %p2575_p0  ;;  %p2624_p8 = por %p2623_p7, %p2622_p4 }
  0x3c   : > { %p2618_p3 = pneg %p2617_p2 }
  0x3e   : > { %p2625_p11 = pnand %p2624_p8, %p2618_p3 }
  0x40   : > { %2628 = shalt.err (!%p2625_p11)
}
  0x41   : > { %s2705_s10 = smov 64   ;;  %s2706_s14 = smov 4  }
  0x42   : > { %2381 = dma.hbm_to_vmem [thread:$0]  (!%p2809_p12), %s3186_s5, 4096, %s2813_s18, [#allocation6], %s2705_s10, %s2705_s10, %s2706_s14  }
  0x43   : > { %p3197_p13 = scmp.ne.s32.totalorder %s3195_s13, 0 }
  0x44   : > { %p3198_p0 = scmp.eq.s32.totalorder (!%p3197_p13), %s2773_s28, 0 }
  0x45   : > { %267 = sbr.rel (%p3197_p13) target bundleno = 838 (0x346), region = 48 }
  0x4c   : > { %2674 = dma.done.wait (%p3198_p0), [#allocation3], 8192   ;;  %p3199_p5 = pmov %p3198_p0 }
  0x4d   : > { %p3200_p6 = pmov %p3198_p0 }
  0x4e   : > { %2676 = vsyncadd (%p3199_p5), [#allocation3], 4294959104 }
  0x4f   : > { %2678 = dma.done.wait (%p3200_p6), [#allocation6], 4096   ;;  %p3201_p9 = pmov %p3198_p0 }
  0x50   : > { %s303_s16 = smul.u32 19, %s2773_s28  ;;  %v2707_v0 = vmov 0   ;;  %v330_v1 = vld [vmem:[%s3182_s1] sm:$0xff]  ;;  %vm415_vm0 = vcmask 1043456   ;;  %vm384_vm1 = vcmask 64512   ;;  %s300_s10 = sand.u32 1, %s2691_s25  }
  0x51   : > { %2680 = vsyncadd (%p3201_p9), [#allocation6], 4294963200  ;;  %454 = vmatprep.mubr.bf16.mxu0 %v2707_v0  ;;  %534 = vmatprep.mubr.bf16.mxu1 %v2707_v0  ;;  %v2095_v2 = vcombine.high %v330_v1, %v330_v1  ;;  %v2094_v3 = vcombine.low %v330_v1, %v330_v1  ;;  %v2445_v8 = vld [vmem:[#allocation2] ss:$16 sps:$4 sm:$0xff]   ;;  %v2447_v9 = vld [vmem:[#allocation2 + $0x4] ss:$16 sps:$4 sm:$0xff]  }
  0x52   : > { %p304_p12 = scmp.lt.s32.totalorder %s303_s16, 37  ;;  %v2448_v10 = vld [vmem:[#allocation2 + $0x8] ss:$16 sps:$4 sm:$0xff]   ;;  %v2450_v11 = vld [vmem:[#allocation2 + $0xc] ss:$16 sps:$4 sm:$0xff]   ;;  %s2364_s19 = smul.u32 152, %s300_s10 }
  0x53   : > { %2096 = vmatprep.subr.msk.bf16.mxu0 %vm415_vm0, %v2095_v2  ;;  %v417_v4 = vsel %vm415_vm0, %v2094_v3, 0  ;;  %2362 = vmatprep.subr.msk.bf16.mxu1 %vm415_vm0, %v2095_v2  ;;  %v2453_v13 = vld [vmem:[#allocation2 + $0x24] ss:$16 sps:$4 sm:$0xff]   ;;  %v2451_v14 = vld [vmem:[#allocation2 + $0x20] ss:$16 sps:$4 sm:$0xff]   ;;  %p3202_p1 = scmp.ne.s32.totalorder %s3193_s11, 0 }
  0x54   : > { %s3210_s16 = smov (!%p304_p12, %s303_s16), 37  ;;  %423 = vmatpush1.bf16.msra.mxu0 %v417_v4  ;;  %2363 = vmatpush1.bf16.msra.mxu1 %v417_v4  ;;  %v2456_v15 = vld [vmem:[#allocation2 + $0x2c] ss:$16 sps:$4 sm:$0xff]   ;;  %v2454_v16 = vld [vmem:[#allocation2 + $0x28] ss:$16 sps:$4 sm:$0xff]   ;;  %s2709_s29 = smov [#allocation7]  }
  0x55   : > { %s2083_s13 = sshll.u32 %s3210_s16, 2  ;;  %1035 = vmatprep.subr.bf16.mxu1 %v2447_v9  ;;  %1166 = vmatprep.subr.bf16.mxu0 %v2450_v11  ;;  %v2459_v17 = vld [vmem:[#allocation2 + $0x44] ss:$16 sps:$4 sm:$0xff]   ;;  %v2462_v19 = vld [vmem:[#allocation2 + $0x4c] ss:$16 sps:$4 sm:$0xff]   ;;  %s3091_s16 = scalar_lea.vmem [#allocation7], %s2364_s19 }
  0x56   : > { %s2881_s23 = scalar_lea.vmem %s3181_s0, %s2083_s13  ;;  %v2457_v20 = vld [vmem:[#allocation2 + $0x40] ss:$16 sps:$4 sm:$0xff]   ;;  %v2465_v21 = vld [vmem:[#allocation2 + $0x64] ss:$16 sps:$4 sm:$0xff]   ;;  %v2460_v22 = vld [vmem:[#allocation2 + $0x48] ss:$16 sps:$4 sm:$0xff]  }
  0x57   : > { %v2435_v5 = vld [vmem:[%s2881_s23] sm:$0xff]   ;;  %v2436_v7 = vld [vmem:[%s2881_s23 + $0x8] sm:$0xff]   ;;  %v2437_v18 = vld [vmem:[%s2881_s23 + $0x10] sm:$0xff]   ;;  %s2209_s13 = smul.u32 2432, %s2773_s28  ;;  %s1991_s18 = sshll.u32 %s3091_s16, 4  ;;  %s3135_s18 = int_to_ptr.vmem [resolvable:$true] %s1991_s18 }
  0x58   : > { %2097 = vmatmul.mubr.msk.bf16.vlgmr.msra.gmra.mrb[0].mxu0 %vm384_vm1, %v2435_v5  ;;  %v2443_v6 = vld [vmem:[%s2881_s23 + $0x40] sm:$0xff]   ;;  %v2444_v12 = vld [vmem:[%s2881_s23 + $0x48] ss:$0 sps:$4 sm:$0xff]   ;;  %v2468_v23 = vld [vmem:[#allocation2 + $0x6c] ss:$16 sps:$4 sm:$0xff]   ;;  %s3140_s28 = scalar_lea.sflag [#allocation4], %s300_s10 }
  0x59   : > { %464 = vmatprep.mubr.bf16.mxu0 %v2707_v0  ;;  %2105 = vmatmul.mubr.msk.bf16.vlgmr.msra.gmra.mrb[0].mxu1 %vm384_vm1, %v2443_v6  ;;  %v2463_v24 = vld [vmem:[#allocation2 + $0x60] ss:$16 sps:$4 sm:$0xff]   ;;  %v2471_v25 = vld [vmem:[#allocation2 + $0x84] ss:$16 sps:$4 sm:$0xff]   ;;  %v2466_v26 = vld [vmem:[#allocation2 + $0x68] ss:$16 sps:$4 sm:$0xff]   ;;  %s3133_s22 = scalar_lea.hbm %s3188_s7, %s2209_s13 }
  0x5a   : > { %544 = vmatprep.mubr.bf16.mxu1 %v2707_v0  ;;  %1036 = vmatpush1.bf16.msra.mxu1 %v2445_v8  ;;  %v2438_v27 = vld [vmem:[%s2881_s23 + $0x18] sm:$0xff]   ;;  %v2469_v29 = vld [vmem:[#allocation2 + $0x80] ss:$16 sps:$4 sm:$0xff]   ;;  %v2477_v30 = vld [vmem:[#allocation2 + $0xa4] ss:$16 sps:$4 sm:$0xff]   ;;  %s2633_s8 = sshll.u32 %s2709_s29, 4  ;;  %s2634_s8 = int_to_ptr.vmem [resolvable:$false] %s2633_s8 }
  0x5b   : > { %1037 = vmatprep.subr.bf16.mxu1 %v2453_v13  ;;  %1167 = vmatpush1.bf16.msra.mxu0 %v2448_v10  ;;  %v2474_v28 = vld [vmem:[#allocation2 + $0x8c] ss:$16 sps:$4 sm:$0xff]   ;;  %v2472_v31 = vld [vmem:[#allocation2 + $0x88] ss:$16 sps:$4 sm:$0xff]   ;;  %v2475_v33 = vld [vmem:[#allocation2 + $0xa0] ss:$16 sps:$4 sm:$0xff]   ;;  %p2636_p4 = scmp.lt.s32.totalorder %s3135_s18, %s2634_s8 }
  0x5c   : > { %1168 = vmatprep.subr.bf16.mxu0 %v2456_v15  ;;  %v2480_v32 = vld [vmem:[#allocation2 + $0xac] ss:$16 sps:$4 sm:$0xff]   ;;  %v2483_v34 = vld [vmem:[#allocation2 + $0xc4] ss:$16 sps:$4 sm:$0xff]   ;;  %v2478_v35 = vld [vmem:[#allocation2 + $0xa8] ss:$16 sps:$4 sm:$0xff]  }
  0x5d   : > { %v2439_v36 = vld [vmem:[%s2881_s23 + $0x20] sm:$0xff]   ;;  %v2486_v37 = vld [vmem:[#allocation2 + $0xcc] ss:$16 sps:$4 sm:$0xff]   ;;  %v2484_v40 = vld [vmem:[#allocation2 + $0xc8] ss:$16 sps:$4 sm:$0xff]   ;;  %s2635_s9 = scalar_lea.vmem %s2634_s8, 4864 }
  0x5e   : > { %1038 = vmatpush1.bf16.msra.mxu1 %v2451_v14  ;;  %v2481_v38 = vld [vmem:[#allocation2 + $0xc0] ss:$16 sps:$4 sm:$0xff]   ;;  %v2489_v39 = vld [vmem:[#allocation2 + $0xe4] ss:$16 sps:$4 sm:$0xff]   ;;  %v2492_v41 = vld [vmem:[#allocation2 + $0xec] ss:$16 sps:$4 sm:$0xff]  }
  0x5f   : > { %1039 = vmatprep.subr.bf16.mxu1 %v2459_v17  ;;  %1169 = vmatpush1.bf16.msra.mxu0 %v2454_v16  ;;  %v2487_v42 = vld [vmem:[#allocation2 + $0xe0] ss:$16 sps:$4 sm:$0xff]   ;;  %v2495_v43 = vld [vmem:[#allocation2 + $0x104] ss:$16 sps:$4 sm:$0xff]   ;;  %v2490_v44 = vld [vmem:[#allocation2 + $0xe8] ss:$16 sps:$4 sm:$0xff]  }
  0x60   : > { %2098 = vmatmul.mubr.msk.bf16.gmra.mrb[4].mxu0 %vm384_vm1, %v2436_v7  ;;  %1170 = vmatprep.subr.bf16.mxu0 %v2462_v19  ;;  %v2440_v45 = vld [vmem:[%s2881_s23 + $0x28] sm:$0xff]   ;;  %v2493_v47 = vld [vmem:[#allocation2 + $0x100] ss:$16 sps:$4 sm:$0xff]   ;;  %v2501_v48 = vld [vmem:[#allocation2 + $0x124] ss:$16 sps:$4 sm:$0xff]  }
  0x61   : > { %474 = vmatprep.mubr.bf16.mxu0 %v2707_v0  ;;  %2106 = vmatmul.mubr.msk.bf16.gmra.mrb[4].mxu1 %vm384_vm1, %v2444_v12  ;;  %v2498_v46 = vld [vmem:[#allocation2 + $0x10c] ss:$16 sps:$4 sm:$0xff]   ;;  %v2496_v49 = vld [vmem:[#allocation2 + $0x108] ss:$16 sps:$4 sm:$0xff]   ;;  %v2499_v50 = vld [vmem:[#allocation2 + $0x120] ss:$16 sps:$4 sm:$0xff]  }
  0x62   : > { %1040 = vmatpush1.bf16.msra.mxu1 %v2457_v20  ;;  %v2504_v51 = vld [vmem:[#allocation2 + $0x12c] ss:$16 sps:$4 sm:$0xff]   ;;  %v2502_v52 = vld [vmem:[#allocation2 + $0x128] ss:$16 sps:$4 sm:$0xff]   ;;  %v2507_v53 = vld [vmem:[#allocation2 + $0x144] ss:$16 sps:$4 sm:$0xff]   ;;  %v586_v20 = vlaneseq }
  0x63   : > { %1041 = vmatprep.subr.bf16.mxu1 %v2465_v21  ;;  %1171 = vmatpush1.bf16.msra.mxu0 %v2460_v22  ;;  %v2510_v54 = vld [vmem:[#allocation2 + $0x14c] ss:$16 sps:$4 sm:$0xff]   ;;  %v2505_v55 = vld [vmem:[#allocation2 + $0x140] ss:$16 sps:$4 sm:$0xff]   ;;  %v2513_v57 = vld [vmem:[#allocation2 + $0x164] ss:$16 sps:$4 sm:$0xff]  }
  0x64   : > { %1172 = vmatprep.subr.bf16.mxu0 %v2468_v23  ;;  %v2441_v56 = vld [vmem:[%s2881_s23 + $0x30] sm:$0xff]   ;;  %v2508_v58 = vld [vmem:[#allocation2 + $0x148] ss:$16 sps:$4 sm:$0xff]   ;;  %v2516_v59 = vld [vmem:[#allocation2 + $0x16c] ss:$16 sps:$4 sm:$0xff]   ;;  %v587_v22 = vshrl.u32 %v586_v20, 7 }
  0x65   : > { %v2511_v60 = vld [vmem:[#allocation2 + $0x160] ss:$16 sps:$4 sm:$0xff]   ;;  %v2519_v61 = vld [vmem:[#allocation2 + $0x184] ss:$16 sps:$4 sm:$0xff]   ;;  %v2514_v62 = vld [vmem:[#allocation2 + $0x168] ss:$16 sps:$4 sm:$0xff]  }
  0x66   : > { %1042 = vmatpush1.bf16.msra.mxu1 %v2463_v24  ;;  %v2522_v63 = vld [vmem:[#allocation2 + $0x18c] ss:$16 sps:$4 sm:$0xff]   ;;  %v2517_v1 = vld [vmem:[#allocation2 + $0x180] ss:$16 sps:$4 sm:$0xff]   ;;  %v2525_v3 = vld [vmem:[#allocation2 + $0x1a4] ss:$16 sps:$4 sm:$0xff]  }
  0x67   : > { %1043 = vmatprep.subr.bf16.mxu1 %v2471_v25  ;;  %1173 = vmatpush1.bf16.msra.mxu0 %v2466_v26  ;;  %v2442_v2 = vld [vmem:[%s2881_s23 + $0x38] sm:$0xff]   ;;  %v2523_v6 = vld [vmem:[#allocation2 + $0x1a0] ss:$16 sps:$4 sm:$0xff]   ;;  %v2531_v8 = vld [vmem:[#allocation2 + $0x1c4] ss:$16 sps:$4 sm:$0xff]   ;;  %s2629_s23 = scalar_lea.vmem %s3135_s18, 2432 }
  0x68   : > { %2099 = vmatmul.mubr.msk.bf16.gmra.mrb[8].mxu0 %vm384_vm1, %v2437_v18  ;;  %1174 = vmatprep.subr.bf16.mxu0 %v2474_v28  ;;  %v2520_v4 = vld [vmem:[#allocation2 + $0x188] ss:$16 sps:$4 sm:$0xff]   ;;  %v2528_v5 = vld [vmem:[#allocation2 + $0x1ac] ss:$16 sps:$4 sm:$0xff]   ;;  %v2529_v10 = vld [vmem:[#allocation2 + $0x1c0] ss:$16 sps:$4 sm:$0xff]   ;;  %p2630_p10 = scmp.ne.s32.totalorder %s3135_s18, %s2629_s23  ;;  %p2637_p7 = scmp.lt.s32.totalorder %s2635_s9, %s2629_s23 }
  0x69   : > { %484 = vmatprep.mubr.bf16.mxu0 %v2707_v0  ;;  %v2526_v7 = vld [vmem:[#allocation2 + $0x1a8] ss:$16 sps:$4 sm:$0xff]   ;;  %v2534_v9 = vld [vmem:[#allocation2 + $0x1cc] ss:$16 sps:$4 sm:$0xff]   ;;  %v2537_v12 = vld [vmem:[#allocation2 + $0x1e4] ss:$16 sps:$4 sm:$0xff]  }
  0x6a   : > { %1044 = vmatpush1.bf16.msra.mxu1 %v2469_v29  ;;  %v2532_v11 = vld [vmem:[#allocation2 + $0x1c8] ss:$16 sps:$4 sm:$0xff]   ;;  %v2540_v13 = vld [vmem:[#allocation2 + $0x1ec] ss:$16 sps:$4 sm:$0xff]   ;;  %v2535_v14 = vld [vmem:[#allocation2 + $0x1e0] ss:$16 sps:$4 sm:$0xff]   ;;  %p2631_p2 = pnand %p2630_p10, %p3202_p1  ;;  %p2638_p8 = por %p2637_p7, %p2636_p4 }
  0x6b   : > { %1045 = vmatprep.subr.bf16.mxu1 %v2477_v30  ;;  %1175 = vmatpush1.bf16.msra.mxu0 %v2472_v31  ;;  %v2538_v15 = vld [vmem:[#allocation2 + $0x1e8] ss:$16 sps:$4 sm:$0xff]   ;;  %v2541_v16 = vld [vmem:[#allocation5 + $0x40] sm:$0xff]   ;;  %v2708_v18 = vmov 1966171168   ;;  %v2918_v29 = vsub.s32 0, %v587_v22 }
  0x6c   : > { %1176 = vmatprep.subr.bf16.mxu0 %v2480_v32  ;;  %v2543_v17 = vld [vmem:[#allocation5 + $0xc0] sm:$0xff]   ;;  %v584_v19 = vunpack.c.l.s4 %v2708_v18  ;;  %v2555_v18 = vld [vmem:[#allocation5 + $0xd8] sm:$0xff]   ;;  %p2632_p3 = pneg %p2631_p2 }
  0x6d   : > { %v2107_v23 = vld.sshfl [vmem:[%s3183_s2] sm:$0x11 pattern:$0x75316420] }
  0x6e   : > { %1046 = vmatpush1.bf16.msra.mxu1 %v2475_v33  ;;  %v585_v21 = vunpack.c.0.s8 %v584_v19  ;;  %v582_v25 = vcombine.high %v2107_v23, %v2107_v23  ;;  %p2639_p11 = pnand %p2638_p8, %p2632_p3 }
  0x6f   : > { %1047 = vmatprep.subr.bf16.mxu1 %v2483_v34  ;;  %1177 = vmatpush1.bf16.msra.mxu0 %v2478_v35 }
  0x70   : > { %2100 = vmatmul.mubr.msk.bf16.gmra.mrb[12].mxu0 %vm384_vm1, %v2438_v27  ;;  %1178 = vmatprep.subr.bf16.mxu0 %v2486_v37  ;;  %v2914_v24 = vsub.s32 %v585_v21, %v587_v22 }
  0x71   : > { %494 = vmatprep.mubr.bf16.mxu0 %v2707_v0 }
  0x72   : > { %1048 = vmatpush1.bf16.msra.mxu1 %v2481_v38  ;;  %v589_v26 = vrot.slane %v2107_v23, %v2914_v24  ;;  %v596_v27 = vrot.slane %v582_v25, %v2914_v24  ;;  %v2554_v23 = vld [vmem:[#allocation5 + $0x18] sm:$0xff]  }
  0x73   : > { %1049 = vmatprep.subr.bf16.mxu1 %v2489_v39  ;;  %1179 = vmatpush1.bf16.msra.mxu0 %v2484_v40  ;;  %v2556_v25 = vld [vmem:[#allocation5 + $0x98] sm:$0xff]  }
  0x74   : > { %1180 = vmatprep.subr.bf16.mxu0 %v2492_v41  ;;  %v598_v28 = vpack.i.b16 %v589_v26, %v589_v26  ;;  %v605_v30 = vpack.i.b16 %v596_v27, %v596_v27  ;;  %v2557_v27 = vld [vmem:[#allocation5 + $0x60] sm:$0xff]  }
  0x76   : > { %1050 = vmatpush1.bf16.msra.mxu1 %v2487_v42  ;;  %v2921_v33 = vrot.slane %v598_v28, %v2918_v29  ;;  %v2924_v35 = vrot.slane %v605_v30, %v2918_v29  ;;  %v2559_v28 = vld [vmem:[#allocation5 + $0xe0] sm:$0xff]  }
  0x77   : > { %1051 = vmatprep.subr.bf16.mxu1 %v2495_v43  ;;  %1181 = vmatpush1.bf16.msra.mxu0 %v2490_v44 }
  0x78   : > { %2101 = vmatmul.mubr.msk.bf16.gmra.mrb[16].mxu0 %vm384_vm1, %v2439_v36  ;;  %1182 = vmatprep.subr.bf16.mxu0 %v2498_v46 }
  0x79   : > { %504 = vmatprep.mubr.bf16.mxu0 %v2707_v0 }
  0x7a   : > { %1052 = vmatpush1.bf16.msra.mxu1 %v2493_v47 }
  0x7b   : > { %1053 = vmatprep.subr.bf16.mxu1 %v2501_v48  ;;  %1183 = vmatpush1.bf16.msra.mxu0 %v2496_v49  ;;  %v2542_v49 = vld [vmem:[#allocation5] sm:$0xff]  }
  0x7c   : > { %1184 = vmatprep.subr.bf16.mxu0 %v2504_v51 }
  0x7e   : > { %1054 = vmatpush1.bf16.msra.mxu1 %v2499_v50  ;;  %v2544_v50 = vld [vmem:[#allocation5 + $0x80] sm:$0xff]  }
  0x7f   : > { %1055 = vmatprep.subr.bf16.mxu1 %v2507_v53  ;;  %1185 = vmatpush1.bf16.msra.mxu0 %v2502_v52 }
  0x80   : > { %2102 = vmatmul.mubr.msk.bf16.gmra.mrb[20].mxu0 %vm384_vm1, %v2440_v45  ;;  %1186 = vmatprep.subr.bf16.mxu0 %v2510_v54  ;;  %v2545_v54 = vld [vmem:[#allocation5 + $0x48] sm:$0xff]  }
  0x81   : > { %514 = vmatprep.mubr.bf16.mxu0 %v2707_v0 }
  0x82   : > { %1056 = vmatpush1.bf16.msra.mxu1 %v2505_v55  ;;  %v2547_v55 = vld [vmem:[#allocation5 + $0xc8] sm:$0xff]  }
  0x83   : > { %1057 = vmatprep.subr.bf16.mxu1 %v2513_v57  ;;  %1187 = vmatpush1.bf16.msra.mxu0 %v2508_v58 }
  0x84   : > { %1188 = vmatprep.subr.bf16.mxu0 %v2516_v59 }
  0x86   : > { %1058 = vmatpush1.bf16.msra.mxu1 %v2511_v60 }
  0x87   : > { %1059 = vmatprep.subr.bf16.mxu1 %v2519_v61  ;;  %1189 = vmatpush1.bf16.msra.mxu0 %v2514_v62  ;;  %v2546_v61 = vld [vmem:[#allocation5 + $0x8] sm:$0xff]  }
  0x88   : > { %2103 = vmatmul.mubr.msk.bf16.gmra.mrb[24].mxu0 %vm384_vm1, %v2441_v56  ;;  %1190 = vmatprep.subr.bf16.mxu0 %v2522_v63  ;;  %v2548_v62 = vld [vmem:[#allocation5 + $0x88] sm:$0xff]  }
  0x89   : > { %524 = vmatprep.mubr.bf16.mxu0 %v2707_v0 }
  0x8a   : > { %1060 = vmatpush1.bf16.msra.mxu1 %v2517_v1 }
  0x8b   : > { %1061 = vmatprep.subr.bf16.mxu1 %v2525_v3  ;;  %1191 = vmatpush1.bf16.msra.mxu0 %v2520_v4  ;;  %v2549_v3 = vld [vmem:[#allocation5 + $0x50] sm:$0xff]  }
  0x8c   : > { %1192 = vmatprep.subr.bf16.mxu0 %v2528_v5  ;;  %v2551_v4 = vld [vmem:[#allocation5 + $0xd0] sm:$0xff]  }
  0x8e   : > { %1062 = vmatpush1.bf16.msra.mxu1 %v2523_v6 }
  0x8f   : > { %1193 = vmatpush1.bf16.msra.mxu0 %v2526_v7  ;;  %1063 = vmatprep.subr.bf16.mxu1 %v2531_v8 }
  0x90   : > { %2104 = vmatmul.mubr.msk.bf16.gmra.mrb[28].mxu0 %vm384_vm1, %v2442_v2  ;;  %1194 = vmatprep.subr.bf16.mxu0 %v2534_v9 }
  0x92   : > { %1064 = vmatpush1.bf16.msra.mxu1 %v2529_v10 }
  0x93   : > { %1195 = vmatpush1.bf16.msra.mxu0 %v2532_v11  ;;  %1065 = vmatprep.subr.bf16.mxu1 %v2537_v12 }
  0x94   : > { %1196 = vmatprep.subr.bf16.mxu0 %v2540_v13  ;;  %v2550_v13 = vld [vmem:[#allocation5 + $0x10] sm:$0xff]  }
  0x96   : > { %1066 = vmatpush1.bf16.msra.mxu1 %v2535_v14  ;;  %v2552_v14 = vld [vmem:[#allocation5 + $0x90] sm:$0xff]  }
  0x97   : > { %1197 = vmatpush1.bf16.msra.mxu0 %v2538_v15  ;;  %2210 = vmatprep.subr.bf16.mxu1 %v2541_v16 }
  0x98   : > { %2286 = vmatprep.subr.bf16.mxu0 %v2543_v17  ;;  %v2553_v17 = vld [vmem:[#allocation5 + $0x58] sm:$0xff]  }
 0x12b   : > { %v456_v31 = vpop.f32.mrb[0].mxu0 }
 0x12c   : > { %v458_v32 = vpop.f32.mrb[1].mxu0  ;;  %v536_v39 = vpop.f32.mrb[0].mxu1 }
 0x12d   : > { %v460_v34 = vpop.f32.mrb[2].mxu0  ;;  %v2927_v41 = vpop.f32.mrb[1].mxu1 }
 0x12e   : > { %v553_v36 = vpack.c.bf16 %v460_v34, %v456_v31  ;;  %v462_v37 = vpop.f32.mrb[3].mxu0  ;;  %v540_v43 = vpop.f32.mrb[2].mxu1  ;;  %v2558_v34 = vld [vmem:[#allocation5 + $0x20] sm:$0xff]  }
 0x12f   : > { %v554_v38 = vpack.c.bf16 %v462_v37, %v458_v32  ;;  %v569_v44 = vpack.c.bf16 %v540_v43, %v536_v39  ;;  %v2930_v45 = vpop.f32.mrb[3].mxu1  ;;  %v2561_v39 = vld [vmem:[#allocation5 + $0x68] sm:$0xff]  }
 0x130   : > { %v611_v40 = vadd.bf16 %v2921_v33, %v553_v36  ;;  %v570_v48 = vpack.c.bf16 %v2930_v45, %v2927_v41  ;;  %v2560_v36 = vld [vmem:[#allocation5 + $0xa0] sm:$0xff]   ;;  %v2569_v45 = vld [vmem:[#allocation5 + $0x78] sm:$0xff]  }
 0x131   : > { %v612_v42 = vadd.bf16 %v2924_v35, %v554_v38  ;;  %v2937_v53 = vadd.bf16 %v2921_v33, %v569_v44 }
 0x132   : > { %v631_v51 = vmax.bf16 %v2707_v0, %v611_v40  ;;  %v2563_v40 = vld [vmem:[#allocation5 + $0xe8] sm:$0xff]  }
 0x133   : > { %v466_v46 = vpop.f32.mrb[4].mxu0  ;;  %v632_v47 = vmax.bf16 %v2707_v0, %v612_v42 }
 0x134   : > { %v468_v52 = vpop.f32.mrb[5].mxu0  ;;  %v546_v60 = vpop.f32.mrb[4].mxu1 }
 0x135   : > { %v470_v56 = vpop.f32.mrb[6].mxu0  ;;  %1067 = vmatprep.mubr.bf16.mxu1 %v632_v47  ;;  %1198 = vmatprep.mubr.bf16.mxu0 %v632_v47  ;;  %v571_v1 = vpack.c.bf16 %v546_v60, %v546_v60  ;;  %v548_v2 = vpop.f32.mrb[5].mxu1  ;;  %v2562_v47 = vld [vmem:[#allocation5 + $0x28] sm:$0xff]  }
 0x136   : > { %v555_v57 = vpack.c.bf16 %v470_v56, %v466_v46  ;;  %v472_v58 = vpop.f32.mrb[7].mxu0  ;;  %1068 = vmatmul.mubr.bf16.vlgmr.msra.gmra.mrb[8].mxu1 %v631_v51  ;;  %1199 = vmatmul.mubr.bf16.vlgmr.msra.gmra.mrb[32].mxu0 %v631_v51  ;;  %v572_v6 = vpack.c.bf16 %v548_v2, %v548_v2  ;;  %v550_v7 = vpop.f32.mrb[6].mxu1  ;;  %v2565_v51 = vld [vmem:[#allocation5 + $0x70] sm:$0xff]  }
 0x137   : > { %v556_v59 = vpack.c.bf16 %v472_v58, %v468_v52  ;;  %2211 = vmatpush3.bf16.msra.mxu1 %v2542_v49  ;;  %2287 = vmatpush3.bf16.msra.mxu0 %v2544_v50  ;;  %v2942_v8 = vadd.bf16 %v2921_v33, %v571_v1  ;;  %v551_v9 = vpop.f32.mrb[7].mxu1  ;;  %v2564_v49 = vld [vmem:[#allocation5 + $0xa8] sm:$0xff]   ;;  %v2567_v52 = vld [vmem:[#allocation5 + $0xf0] sm:$0xff]  }
 0x138   : > { %v613_v63 = vadd.bf16 %v2921_v33, %v555_v57  ;;  %2212 = vmatprep.subr.bf16.mxu1 %v2545_v54  ;;  %2288 = vmatprep.subr.bf16.mxu0 %v2547_v55  ;;  %v2946_v12 = vadd.bf16 %v2924_v35, %v572_v6  ;;  %v2566_v57 = vld [vmem:[#allocation5 + $0x30] sm:$0xff]  }
 0x139   : > { %v614_v5 = vadd.bf16 %v2924_v35, %v556_v59  ;;  %v2568_v58 = vld [vmem:[#allocation5 + $0xb0] sm:$0xff]  }
 0x13a   : > { %v633_v16 = vmax.bf16 %v2707_v0, %v613_v63  ;;  %v650_v41 = vmax.bf16 %v2707_v0, %v2946_v12 }
 0x13b   : > { %v476_v10 = vpop.f32.mrb[8].mxu0  ;;  %v634_v11 = vmax.bf16 %v2707_v0, %v614_v5  ;;  %2213 = vmatpush3.bf16.msra.mxu1 %v2546_v61  ;;  %2289 = vmatpush3.bf16.msra.mxu0 %v2548_v62 }
 0x13c   : > { %v478_v15 = vpop.f32.mrb[9].mxu0  ;;  %2214 = vmatprep.subr.bf16.mxu1 %v2549_v3  ;;  %2290 = vmatprep.subr.bf16.mxu0 %v2551_v4 }
 0x13d   : > { %v480_v19 = vpop.f32.mrb[10].mxu0  ;;  %1077 = vmatprep.mubr.bf16.mxu1 %v634_v11  ;;  %1208 = vmatprep.mubr.bf16.mxu0 %v634_v11 }
 0x13e   : > { %v557_v20 = vpack.c.bf16 %v480_v19, %v476_v10  ;;  %v482_v21 = vpop.f32.mrb[11].mxu0  ;;  %1078 = vmatmul.mubr.bf16.gmra.mrb[12].mxu1 %v633_v16  ;;  %1209 = vmatmul.mubr.bf16.gmra.mrb[36].mxu0 %v633_v16 }
 0x13f   : > { %v558_v22 = vpack.c.bf16 %v482_v21, %v478_v15  ;;  %2215 = vmatpush3.bf16.msra.mxu1 %v2550_v13  ;;  %2291 = vmatpush3.bf16.msra.mxu0 %v2552_v14 }
 0x140   : > { %v615_v26 = vadd.bf16 %v2921_v33, %v557_v20  ;;  %2216 = vmatprep.subr.bf16.mxu1 %v2553_v17  ;;  %2292 = vmatprep.subr.bf16.mxu0 %v2555_v18 }
 0x141   : > { %v616_v30 = vadd.bf16 %v2924_v35, %v558_v22 }
 0x142   : > { %v635_v38 = vmax.bf16 %v2707_v0, %v615_v26 }
 0x143   : > { %v486_v31 = vpop.f32.mrb[12].mxu0  ;;  %v636_v32 = vmax.bf16 %v2707_v0, %v616_v30  ;;  %2217 = vmatpush3.bf16.msra.mxu1 %v2554_v23  ;;  %2293 = vmatpush3.bf16.msra.mxu0 %v2556_v25 }
 0x144   : > { %v488_v37 = vpop.f32.mrb[13].mxu0  ;;  %2218 = vmatprep.subr.bf16.mxu1 %v2557_v27  ;;  %2294 = vmatprep.subr.bf16.mxu0 %v2559_v28 }
 0x145   : > { %v490_v42 = vpop.f32.mrb[14].mxu0  ;;  %1087 = vmatprep.mubr.bf16.mxu1 %v636_v32  ;;  %1218 = vmatprep.mubr.bf16.mxu0 %v636_v32 }
 0x146   : > { %v559_v43 = vpack.c.bf16 %v490_v42, %v486_v31  ;;  %v492_v44 = vpop.f32.mrb[15].mxu0  ;;  %1088 = vmatmul.mubr.bf16.gmra.mrb[16].mxu1 %v635_v38  ;;  %1219 = vmatmul.mubr.bf16.gmra.mrb[40].mxu0 %v635_v38  ;;  %v628_v38 = vadd.bf16 %v2924_v35, %v570_v48  ;;  %v2570_v48 = vld [vmem:[#allocation5 + $0x38] sm:$0xff]  }
 0x147   : > { %v560_v46 = vpack.c.bf16 %v492_v44, %v488_v37  ;;  %2219 = vmatpush3.bf16.msra.mxu1 %v2558_v34  ;;  %2295 = vmatpush3.bf16.msra.mxu0 %v2560_v36 }
 0x148   : > { %v617_v50 = vadd.bf16 %v2921_v33, %v559_v43  ;;  %2220 = vmatprep.subr.bf16.mxu1 %v2561_v39  ;;  %2296 = vmatprep.subr.bf16.mxu0 %v2563_v40  ;;  %v648_v43 = vmax.bf16 %v2707_v0, %v628_v38 }
 0x149   : > { %v618_v54 = vadd.bf16 %v2924_v35, %v560_v46  ;;  %v2571_v46 = vld [vmem:[#allocation5 + $0xf8] sm:$0xff]  }
 0x14a   : > { %v637_v60 = vmax.bf16 %v2707_v0, %v617_v50 }
 0x14b   : > { %v496_v55 = vpop.f32.mrb[16].mxu0  ;;  %v638_v56 = vmax.bf16 %v2707_v0, %v618_v54  ;;  %2221 = vmatpush3.bf16.msra.mxu1 %v2562_v47  ;;  %2297 = vmatpush3.bf16.msra.mxu0 %v2564_v49  ;;  %v2572_v47 = vld [vmem:[#allocation5 + $0xb8] sm:$0xff]  }
 0x14c   : > { %v498_v59 = vpop.f32.mrb[17].mxu0  ;;  %2222 = vmatprep.subr.bf16.mxu1 %v2565_v51  ;;  %2298 = vmatprep.subr.bf16.mxu0 %v2567_v52 }
 0x14d   : > { %v500_v61 = vpop.f32.mrb[18].mxu0  ;;  %1097 = vmatprep.mubr.bf16.mxu1 %v638_v56  ;;  %1228 = vmatprep.mubr.bf16.mxu0 %v638_v56 }
 0x14e   : > { %v561_v62 = vpack.c.bf16 %v500_v61, %v496_v55  ;;  %v502_v63 = vpop.f32.mrb[19].mxu0  ;;  %1098 = vmatmul.mubr.bf16.gmra.mrb[20].mxu1 %v637_v60  ;;  %1229 = vmatmul.mubr.bf16.gmra.mrb[44].mxu0 %v637_v60 }
 0x14f   : > { %v562_v1 = vpack.c.bf16 %v502_v63, %v498_v59  ;;  %2223 = vmatpush3.bf16.msra.mxu1 %v2566_v57  ;;  %2299 = vmatpush3.bf16.msra.mxu0 %v2568_v58 }
 0x150   : > { %v619_v2 = vadd.bf16 %v2921_v33, %v561_v62  ;;  %2224 = vmatprep.subr.bf16.mxu1 %v2569_v45  ;;  %2300 = vmatprep.subr.bf16.mxu0 %v2571_v46 }
 0x151   : > { %v620_v3 = vadd.bf16 %v2924_v35, %v562_v1 }
 0x152   : > { %v639_v7 = vmax.bf16 %v2707_v0, %v619_v2 }
 0x153   : > { %v506_v4 = vpop.f32.mrb[20].mxu0  ;;  %v640_v5 = vmax.bf16 %v2707_v0, %v620_v3  ;;  %2225 = vmatpush3.bf16.msra.mxu1 %v2570_v48  ;;  %2301 = vmatpush3.bf16.msra.mxu0 %v2572_v47 }
 0x154   : > { %v508_v6 = vpop.f32.mrb[21].mxu0 }
 0x155   : > { %v510_v9 = vpop.f32.mrb[22].mxu0  ;;  %1107 = vmatprep.mubr.bf16.mxu1 %v640_v5  ;;  %1238 = vmatprep.mubr.bf16.mxu0 %v640_v5 }
 0x156   : > { %v563_v10 = vpack.c.bf16 %v510_v9, %v506_v4  ;;  %v512_v11 = vpop.f32.mrb[23].mxu0  ;;  %1108 = vmatmul.mubr.bf16.gmra.mrb[24].mxu1 %v639_v7  ;;  %1239 = vmatmul.mubr.bf16.gmra.mrb[48].mxu0 %v639_v7 }
 0x157   : > { %v564_v13 = vpack.c.bf16 %v512_v11, %v508_v6 }
 0x158   : > { %v621_v14 = vadd.bf16 %v2921_v33, %v563_v10 }
 0x159   : > { %v622_v15 = vadd.bf16 %v2924_v35, %v564_v13 }
 0x15a   : > { %v641_v19 = vmax.bf16 %v2707_v0, %v621_v14 }
 0x15b   : > { %v516_v16 = vpop.f32.mrb[24].mxu0  ;;  %v642_v17 = vmax.bf16 %v2707_v0, %v622_v15 }
 0x15c   : > { %v518_v18 = vpop.f32.mrb[25].mxu0 }
 0x15d   : > { %v520_v20 = vpop.f32.mrb[26].mxu0  ;;  %1117 = vmatprep.mubr.bf16.mxu1 %v642_v17  ;;  %1248 = vmatprep.mubr.bf16.mxu0 %v642_v17 }
 0x15e   : > { %v565_v21 = vpack.c.bf16 %v520_v20, %v516_v16  ;;  %v522_v22 = vpop.f32.mrb[27].mxu0  ;;  %1118 = vmatmul.mubr.bf16.gmra.mrb[28].mxu1 %v641_v19  ;;  %1249 = vmatmul.mubr.bf16.gmra.mrb[52].mxu0 %v641_v19 }
 0x15f   : > { %v566_v23 = vpack.c.bf16 %v522_v22, %v518_v18 }
 0x160   : > { %v623_v25 = vadd.bf16 %v2921_v33, %v565_v21 }
 0x161   : > { %v624_v26 = vadd.bf16 %v2924_v35, %v566_v23 }
 0x162   : > { %v643_v31 = vmax.bf16 %v2707_v0, %v623_v25 }
 0x163   : > { %v526_v27 = vpop.f32.mrb[28].mxu0  ;;  %v644_v28 = vmax.bf16 %v2707_v0, %v624_v26 }
 0x164   : > { %v528_v30 = vpop.f32.mrb[29].mxu0 }
 0x165   : > { %v530_v32 = vpop.f32.mrb[30].mxu0  ;;  %1127 = vmatprep.mubr.bf16.mxu1 %v644_v28  ;;  %1258 = vmatprep.mubr.bf16.mxu0 %v644_v28 }
 0x166   : > { %v567_v34 = vpack.c.bf16 %v530_v32, %v526_v27  ;;  %v532_v36 = vpop.f32.mrb[31].mxu0  ;;  %1128 = vmatmul.mubr.bf16.gmra.mrb[32].mxu1 %v643_v31  ;;  %1259 = vmatmul.mubr.bf16.gmra.mrb[56].mxu0 %v643_v31 }
 0x167   : > { %v568_v37 = vpack.c.bf16 %v532_v36, %v528_v30 }
 0x168   : > { %v625_v39 = vadd.bf16 %v2921_v33, %v567_v34  ;;  %v647_v33 = vmax.bf16 %v2707_v0, %v2937_v53  ;;  %v2172_v53 = vld.sshfl [vmem:[%s3185_s4] sm:$0x33 pattern:$0x75316420] }
 0x169   : > { %v626_v40 = vadd.bf16 %v2924_v35, %v568_v37  ;;  %v649_v35 = vmax.bf16 %v2707_v0, %v2942_v8  ;;  %v1346_v12 = vcombine.high %v2172_v53, %v2172_v53  ;;  %v1353_v49 = vrot.slane %v2172_v53, %v2914_v24 }
 0x16a   : > { %v645_v44 = vmax.bf16 %v2707_v0, %v625_v39 }
 0x16b   : > { %v646_v42 = vmax.bf16 %v2707_v0, %v626_v40  ;;  %v1360_v50 = vrot.slane %v1346_v12, %v2914_v24  ;;  %v1361_v8 = vcombine.high %v1353_v49, %v1353_v49  ;;  %v1364_v52 = vpack.i.b16 %v1353_v49, %v1353_v49 }
 0x16d   : > { %1137 = vmatprep.mubr.bf16.mxu1 %v646_v42  ;;  %1268 = vmatprep.mubr.bf16.mxu0 %v646_v42  ;;  %v1362_v51 = vcombine.high %v1360_v50, %v1360_v50  ;;  %v1378_v54 = vpack.i.b16 %v1361_v8, %v1361_v8  ;;  %v1371_v55 = vpack.i.b16 %v1360_v50, %v1360_v50 }
 0x16e   : > { %1138 = vmatmul.mubr.bf16.gmra.mrb[36].mxu1 %v645_v44  ;;  %1269 = vmatmul.mubr.bf16.gmra.mrb[60].mxu0 %v645_v44  ;;  %v2990_v61 = vrot.slane %v1364_v52, %v2918_v29 }
 0x16f   : > { %1147 = vmatprep.mubr.bf16.mxu1 %v648_v43  ;;  %1278 = vmatprep.mubr.bf16.mxu0 %v648_v43  ;;  %v1385_v56 = vpack.i.b16 %v1362_v51, %v1362_v51  ;;  %v2993_v62 = vrot.slane %v1378_v54, %v2918_v29  ;;  %v2996_v24 = vrot.slane %v1371_v55, %v2918_v29 }
 0x171   : > { %v2999_v2 = vrot.slane %v1385_v56, %v2918_v29 }
 0x176   : > { %1148 = vmatmul.mubr.bf16.gmra.mrb[40].mxu1 %v647_v33  ;;  %1279 = vmatmul.mubr.bf16.gmra.mrb[64].mxu0 %v647_v33 }
 0x177   : > { %1157 = vmatprep.mubr.bf16.mxu1 %v650_v41  ;;  %1288 = vmatprep.mubr.bf16.mxu0 %v650_v41 }
 0x17e   : > { %1158 = vmatmul.mubr.bf16.gmra.mrb[44].mxu1 %v649_v35  ;;  %1289 = vmatmul.mubr.bf16.gmra.mrb[68].mxu0 %v649_v35 }
 0x209   : > { %v1069_v57 = vpop.f32.mrb[8].mxu1  ;;  %v1200_v58 = vpop.f32.mrb[32].mxu0 }
 0x20a   : > { %v1071_v59 = vpop.f32.mrb[9].mxu1  ;;  %v1202_v60 = vpop.f32.mrb[33].mxu0 }
 0x20b   : > { %v1073_v63 = vpop.f32.mrb[10].mxu1  ;;  %v1204_v1 = vpop.f32.mrb[34].mxu0 }
 0x20c   : > { %v1297_v3 = vpack.c.bf16 %v1073_v63, %v1069_v57  ;;  %v1299_v4 = vpack.c.bf16 %v1204_v1, %v1200_v58  ;;  %v1075_v5 = vpop.f32.mrb[11].mxu1  ;;  %v1206_v6 = vpop.f32.mrb[35].mxu0 }
 0x20d   : > { %v1298_v7 = vpack.c.bf16 %v1075_v5, %v1071_v59  ;;  %v1300_v9 = vpack.c.bf16 %v1206_v6, %v1202_v60 }
 0x20e   : > { %v1391_v10 = vadd.bf16 %v2990_v61, %v1297_v3  ;;  %v1393_v11 = vadd.bf16 %v2993_v62, %v1299_v4 }
 0x20f   : > { %v1392_v13 = vadd.bf16 %v2996_v24, %v1298_v7  ;;  %v1394_v14 = vadd.bf16 %v2999_v2, %v1300_v9 }
 0x210   : > { %v1431_v18 = vmax.bf16 %v2707_v0, %v1391_v10  ;;  %v1433_v19 = vmax.bf16 %v2707_v0, %v1393_v11 }
 0x211   : > { %v1079_v15 = vpop.f32.mrb[12].mxu1  ;;  %v1210_v16 = vpop.f32.mrb[36].mxu0  ;;  %v1432_v17 = vmax.bf16 %v2707_v0, %v1392_v13  ;;  %v1434_v29 = vmax.bf16 %v2707_v0, %v1394_v14 }
 0x212   : > { %v1081_v20 = vpop.f32.mrb[13].mxu1  ;;  %v1212_v21 = vpop.f32.mrb[37].mxu0 }
 0x213   : > { %v1083_v22 = vpop.f32.mrb[14].mxu1  ;;  %v1214_v23 = vpop.f32.mrb[38].mxu0  ;;  %1766 = vmatprep.mubr.bf16.mxu1 %v1432_v17  ;;  %1878 = vmatprep.mubr.bf16.mxu0 %v1434_v29 }
 0x214   : > { %v1301_v25 = vpack.c.bf16 %v1083_v22, %v1079_v15  ;;  %v1303_v26 = vpack.c.bf16 %v1214_v23, %v1210_v16  ;;  %v1085_v27 = vpop.f32.mrb[15].mxu1  ;;  %v1216_v28 = vpop.f32.mrb[39].mxu0  ;;  %1767 = vmatmul.mubr.bf16.vlgmr.msra.gmra.mrb[48].mxu1 %v1431_v18  ;;  %1879 = vmatmul.mubr.bf16.vlgmr.msra.gmra.mrb[72].mxu0 %v1433_v19 }
 0x215   : > { %v1302_v30 = vpack.c.bf16 %v1085_v27, %v1081_v20  ;;  %v1304_v31 = vpack.c.bf16 %v1216_v28, %v1212_v21 }
 0x216   : > { %v1395_v32 = vadd.bf16 %v2990_v61, %v1301_v25  ;;  %v1397_v34 = vadd.bf16 %v2993_v62, %v1303_v26 }
 0x217   : > { %v1396_v36 = vadd.bf16 %v2996_v24, %v1302_v30  ;;  %v1398_v37 = vadd.bf16 %v2999_v2, %v1304_v31 }
 0x218   : > { %v1435_v41 = vmax.bf16 %v2707_v0, %v1395_v32  ;;  %v1437_v33 = vmax.bf16 %v2707_v0, %v1397_v34 }
 0x219   : > { %v1089_v38 = vpop.f32.mrb[16].mxu1  ;;  %v1220_v39 = vpop.f32.mrb[40].mxu0  ;;  %v1436_v40 = vmax.bf16 %v2707_v0, %v1396_v36  ;;  %v1438_v42 = vmax.bf16 %v2707_v0, %v1398_v37 }
 0x21a   : > { %v1091_v43 = vpop.f32.mrb[17].mxu1  ;;  %v1222_v44 = vpop.f32.mrb[41].mxu0 }
 0x21b   : > { %v1093_v35 = vpop.f32.mrb[18].mxu1  ;;  %v1224_v45 = vpop.f32.mrb[42].mxu0  ;;  %1774 = vmatprep.mubr.bf16.mxu1 %v1436_v40  ;;  %1886 = vmatprep.mubr.bf16.mxu0 %v1438_v42 }
 0x21c   : > { %v1305_v48 = vpack.c.bf16 %v1093_v35, %v1089_v38  ;;  %v1307_v46 = vpack.c.bf16 %v1224_v45, %v1220_v39  ;;  %v1095_v47 = vpop.f32.mrb[19].mxu1  ;;  %v1226_v53 = vpop.f32.mrb[43].mxu0  ;;  %1775 = vmatmul.mubr.bf16.gmra.mrb[52].mxu1 %v1435_v41  ;;  %1887 = vmatmul.mubr.bf16.gmra.mrb[76].mxu0 %v1437_v33 }
 0x21d   : > { %v1306_v12 = vpack.c.bf16 %v1095_v47, %v1091_v43  ;;  %v1308_v49 = vpack.c.bf16 %v1226_v53, %v1222_v44 }
 0x21e   : > { %v1399_v50 = vadd.bf16 %v2990_v61, %v1305_v48  ;;  %v1401_v8 = vadd.bf16 %v2993_v62, %v1307_v46 }
 0x21f   : > { %v1400_v51 = vadd.bf16 %v2996_v24, %v1306_v12  ;;  %v1402_v52 = vadd.bf16 %v2999_v2, %v1308_v49 }
 0x220   : > { %v1439_v60 = vmax.bf16 %v2707_v0, %v1399_v50  ;;  %v1441_v63 = vmax.bf16 %v2707_v0, %v1401_v8 }
 0x221   : > { %v1099_v54 = vpop.f32.mrb[20].mxu1  ;;  %v1230_v55 = vpop.f32.mrb[44].mxu0  ;;  %v1440_v56 = vmax.bf16 %v2707_v0, %v1400_v51  ;;  %v1442_v57 = vmax.bf16 %v2707_v0, %v1402_v52 }
 0x222   : > { %v1101_v58 = vpop.f32.mrb[21].mxu1  ;;  %v1232_v59 = vpop.f32.mrb[45].mxu0 }
 0x223   : > { %v1103_v1 = vpop.f32.mrb[22].mxu1  ;;  %v1234_v3 = vpop.f32.mrb[46].mxu0  ;;  %1782 = vmatprep.mubr.bf16.mxu1 %v1440_v56  ;;  %1894 = vmatprep.mubr.bf16.mxu0 %v1442_v57 }
 0x224   : > { %v1309_v4 = vpack.c.bf16 %v1103_v1, %v1099_v54  ;;  %v1311_v5 = vpack.c.bf16 %v1234_v3, %v1230_v55  ;;  %v1105_v6 = vpop.f32.mrb[23].mxu1  ;;  %v1236_v7 = vpop.f32.mrb[47].mxu0  ;;  %1783 = vmatmul.mubr.bf16.gmra.mrb[56].mxu1 %v1439_v60  ;;  %1895 = vmatmul.mubr.bf16.gmra.mrb[80].mxu0 %v1441_v63 }
 0x225   : > { %v1310_v9 = vpack.c.bf16 %v1105_v6, %v1101_v58  ;;  %v1312_v10 = vpack.c.bf16 %v1236_v7, %v1232_v59 }
 0x226   : > { %v1403_v11 = vadd.bf16 %v2990_v61, %v1309_v4  ;;  %v1405_v13 = vadd.bf16 %v2993_v62, %v1311_v5 }
 0x227   : > { %v1404_v14 = vadd.bf16 %v2996_v24, %v1310_v9  ;;  %v1406_v15 = vadd.bf16 %v2999_v2, %v1312_v10 }
 0x228   : > { %v1443_v21 = vmax.bf16 %v2707_v0, %v1403_v11  ;;  %v1445_v22 = vmax.bf16 %v2707_v0, %v1405_v13 }
 0x229   : > { %v1109_v16 = vpop.f32.mrb[24].mxu1  ;;  %v1240_v17 = vpop.f32.mrb[48].mxu0  ;;  %v1444_v29 = vmax.bf16 %v2707_v0, %v1404_v14  ;;  %v1446_v18 = vmax.bf16 %v2707_v0, %v1406_v15 }
 0x22a   : > { %v1111_v19 = vpop.f32.mrb[25].mxu1  ;;  %v1242_v20 = vpop.f32.mrb[49].mxu0 }
 0x22b   : > { %v1113_v23 = vpop.f32.mrb[26].mxu1  ;;  %v1244_v25 = vpop.f32.mrb[50].mxu0  ;;  %1790 = vmatprep.mubr.bf16.mxu1 %v1444_v29  ;;  %1902 = vmatprep.mubr.bf16.mxu0 %v1446_v18 }
 0x22c   : > { %v1313_v26 = vpack.c.bf16 %v1113_v23, %v1109_v16  ;;  %v1315_v27 = vpack.c.bf16 %v1244_v25, %v1240_v17  ;;  %v1115_v28 = vpop.f32.mrb[27].mxu1  ;;  %v1246_v30 = vpop.f32.mrb[51].mxu0  ;;  %1791 = vmatmul.mubr.bf16.gmra.mrb[60].mxu1 %v1443_v21  ;;  %1903 = vmatmul.mubr.bf16.gmra.mrb[84].mxu0 %v1445_v22 }
 0x22d   : > { %v1314_v31 = vpack.c.bf16 %v1115_v28, %v1111_v19  ;;  %v1316_v32 = vpack.c.bf16 %v1246_v30, %v1242_v20 }
 0x22e   : > { %v1407_v34 = vadd.bf16 %v2990_v61, %v1313_v26  ;;  %v1409_v36 = vadd.bf16 %v2993_v62, %v1315_v27 }
 0x22f   : > { %v1408_v37 = vadd.bf16 %v2996_v24, %v1314_v31  ;;  %v1410_v38 = vadd.bf16 %v2999_v2, %v1316_v32 }
 0x230   : > { %v1447_v33 = vmax.bf16 %v2707_v0, %v1407_v34  ;;  %v1449_v35 = vmax.bf16 %v2707_v0, %v1409_v36 }
 0x231   : > { %v1119_v39 = vpop.f32.mrb[28].mxu1  ;;  %v1250_v40 = vpop.f32.mrb[52].mxu0  ;;  %v1448_v42 = vmax.bf16 %v2707_v0, %v1408_v37  ;;  %v1450_v43 = vmax.bf16 %v2707_v0, %v1410_v38 }
 0x232   : > { %v1121_v44 = vpop.f32.mrb[29].mxu1  ;;  %v1252_v41 = vpop.f32.mrb[53].mxu0 }
 0x233   : > { %v1123_v45 = vpop.f32.mrb[30].mxu1  ;;  %v1254_v48 = vpop.f32.mrb[54].mxu0  ;;  %1798 = vmatprep.mubr.bf16.mxu1 %v1448_v42  ;;  %1910 = vmatprep.mubr.bf16.mxu0 %v1450_v43 }
 0x234   : > { %v1317_v46 = vpack.c.bf16 %v1123_v45, %v1119_v39  ;;  %v1319_v47 = vpack.c.bf16 %v1254_v48, %v1250_v40  ;;  %v1125_v53 = vpop.f32.mrb[31].mxu1  ;;  %v1256_v12 = vpop.f32.mrb[55].mxu0  ;;  %1799 = vmatmul.mubr.bf16.gmra.mrb[64].mxu1 %v1447_v33  ;;  %1911 = vmatmul.mubr.bf16.gmra.mrb[88].mxu0 %v1449_v35 }
 0x235   : > { %v1318_v49 = vpack.c.bf16 %v1125_v53, %v1121_v44  ;;  %v1320_v50 = vpack.c.bf16 %v1256_v12, %v1252_v41 }
 0x236   : > { %v1411_v8 = vadd.bf16 %v2990_v61, %v1317_v46  ;;  %v1413_v51 = vadd.bf16 %v2993_v62, %v1319_v47 }
 0x237   : > { %v1412_v52 = vadd.bf16 %v2996_v24, %v1318_v49  ;;  %v1414_v54 = vadd.bf16 %v2999_v2, %v1320_v50 }
 0x238   : > { %v1451_v63 = vmax.bf16 %v2707_v0, %v1411_v8  ;;  %v1453_v1 = vmax.bf16 %v2707_v0, %v1413_v51 }
 0x239   : > { %v1129_v55 = vpop.f32.mrb[32].mxu1  ;;  %v1260_v56 = vpop.f32.mrb[56].mxu0  ;;  %v1452_v57 = vmax.bf16 %v2707_v0, %v1412_v52  ;;  %v1454_v58 = vmax.bf16 %v2707_v0, %v1414_v54 }
 0x23a   : > { %v1131_v59 = vpop.f32.mrb[33].mxu1  ;;  %v1262_v60 = vpop.f32.mrb[57].mxu0 }
 0x23b   : > { %v1133_v3 = vpop.f32.mrb[34].mxu1  ;;  %v1264_v4 = vpop.f32.mrb[58].mxu0  ;;  %1806 = vmatprep.mubr.bf16.mxu1 %v1452_v57  ;;  %1918 = vmatprep.mubr.bf16.mxu0 %v1454_v58 }
 0x23c   : > { %v1321_v5 = vpack.c.bf16 %v1133_v3, %v1129_v55  ;;  %v1323_v6 = vpack.c.bf16 %v1264_v4, %v1260_v56  ;;  %v1135_v7 = vpop.f32.mrb[35].mxu1  ;;  %v1266_v9 = vpop.f32.mrb[59].mxu0  ;;  %1807 = vmatmul.mubr.bf16.gmra.mrb[68].mxu1 %v1451_v63  ;;  %1919 = vmatmul.mubr.bf16.gmra.mrb[92].mxu0 %v1453_v1 }
 0x23d   : > { %v1322_v10 = vpack.c.bf16 %v1135_v7, %v1131_v59  ;;  %v1324_v11 = vpack.c.bf16 %v1266_v9, %v1262_v60 }
 0x23e   : > { %v1415_v13 = vadd.bf16 %v2990_v61, %v1321_v5  ;;  %v1417_v14 = vadd.bf16 %v2993_v62, %v1323_v6 }
 0x23f   : > { %v1416_v15 = vadd.bf16 %v2996_v24, %v1322_v10  ;;  %v1418_v16 = vadd.bf16 %v2999_v2, %v1324_v11 }
 0x240   : > { %v1455_v22 = vmax.bf16 %v2707_v0, %v1415_v13  ;;  %v1457_v23 = vmax.bf16 %v2707_v0, %v1417_v14 }
 0x241   : > { %v1139_v17 = vpop.f32.mrb[36].mxu1  ;;  %v1270_v29 = vpop.f32.mrb[60].mxu0  ;;  %v1456_v18 = vmax.bf16 %v2707_v0, %v1416_v15  ;;  %v1458_v19 = vmax.bf16 %v2707_v0, %v1418_v16 }
 0x242   : > { %v1141_v20 = vpop.f32.mrb[37].mxu1  ;;  %v1272_v21 = vpop.f32.mrb[61].mxu0 }
 0x243   : > { %v1143_v25 = vpop.f32.mrb[38].mxu1  ;;  %v1274_v26 = vpop.f32.mrb[62].mxu0  ;;  %1814 = vmatprep.mubr.bf16.mxu1 %v1456_v18  ;;  %1926 = vmatprep.mubr.bf16.mxu0 %v1458_v19 }
 0x244   : > { %v1325_v27 = vpack.c.bf16 %v1143_v25, %v1139_v17  ;;  %v1327_v28 = vpack.c.bf16 %v1274_v26, %v1270_v29  ;;  %v1145_v30 = vpop.f32.mrb[39].mxu1  ;;  %v1276_v31 = vpop.f32.mrb[63].mxu0  ;;  %1815 = vmatmul.mubr.bf16.gmra.mrb[72].mxu1 %v1455_v22  ;;  %1927 = vmatmul.mubr.bf16.gmra.mrb[96].mxu0 %v1457_v23 }
 0x245   : > { %v1326_v32 = vpack.c.bf16 %v1145_v30, %v1141_v20  ;;  %v1328_v34 = vpack.c.bf16 %v1276_v31, %v1272_v21 }
 0x246   : > { %v1419_v36 = vadd.bf16 %v2990_v61, %v1325_v27  ;;  %v1421_v37 = vadd.bf16 %v2993_v62, %v1327_v28 }
 0x247   : > { %v1420_v38 = vadd.bf16 %v2996_v24, %v1326_v32  ;;  %v1422_v39 = vadd.bf16 %v2999_v2, %v1328_v34 }
 0x248   : > { %v1459_v35 = vmax.bf16 %v2707_v0, %v1419_v36  ;;  %v1461_v45 = vmax.bf16 %v2707_v0, %v1421_v37 }
 0x249   : > { %v1149_v40 = vpop.f32.mrb[40].mxu1  ;;  %v1280_v42 = vpop.f32.mrb[64].mxu0  ;;  %v1460_v43 = vmax.bf16 %v2707_v0, %v1420_v38  ;;  %v1462_v44 = vmax.bf16 %v2707_v0, %v1422_v39 }
 0x24a   : > { %v1151_v41 = vpop.f32.mrb[41].mxu1  ;;  %v1282_v33 = vpop.f32.mrb[65].mxu0 }
 0x24b   : > { %v1153_v48 = vpop.f32.mrb[42].mxu1  ;;  %v1284_v46 = vpop.f32.mrb[66].mxu0  ;;  %1822 = vmatprep.mubr.bf16.mxu1 %v1460_v43  ;;  %1934 = vmatprep.mubr.bf16.mxu0 %v1462_v44 }
 0x24c   : > { %v1329_v47 = vpack.c.bf16 %v1153_v48, %v1149_v40  ;;  %v1331_v53 = vpack.c.bf16 %v1284_v46, %v1280_v42  ;;  %v1155_v12 = vpop.f32.mrb[43].mxu1  ;;  %v1286_v49 = vpop.f32.mrb[67].mxu0  ;;  %1823 = vmatmul.mubr.bf16.gmra.mrb[76].mxu1 %v1459_v35  ;;  %1935 = vmatmul.mubr.bf16.gmra.mrb[100].mxu0 %v1461_v45 }
 0x24d   : > { %v1330_v50 = vpack.c.bf16 %v1155_v12, %v1151_v41  ;;  %v1332_v8 = vpack.c.bf16 %v1286_v49, %v1282_v33 }
 0x24e   : > { %v1423_v51 = vadd.bf16 %v2990_v61, %v1329_v47  ;;  %v1425_v52 = vadd.bf16 %v2993_v62, %v1331_v53 }
 0x24f   : > { %v1424_v54 = vadd.bf16 %v2996_v24, %v1330_v50  ;;  %v1426_v55 = vadd.bf16 %v2999_v2, %v1332_v8 }
 0x250   : > { %v1463_v4 = vmax.bf16 %v2707_v0, %v1423_v51  ;;  %v1465_v5 = vmax.bf16 %v2707_v0, %v1425_v52 }
 0x251   : > { %v1159_v56 = vpop.f32.mrb[44].mxu1  ;;  %v1290_v57 = vpop.f32.mrb[68].mxu0  ;;  %v1464_v58 = vmax.bf16 %v2707_v0, %v1424_v54  ;;  %v1466_v59 = vmax.bf16 %v2707_v0, %v1426_v55 }
 0x252   : > { %v1333_v60 = vpack.c.bf16 %v1159_v56, %v1159_v56  ;;  %v1335_v63 = vpack.c.bf16 %v1290_v57, %v1290_v57  ;;  %v1161_v1 = vpop.f32.mrb[45].mxu1  ;;  %v1292_v3 = vpop.f32.mrb[69].mxu0 }
 0x253   : > { %v1334_v6 = vpack.c.bf16 %v1161_v1, %v1161_v1  ;;  %v1336_v7 = vpack.c.bf16 %v1292_v3, %v1292_v3  ;;  %v1163_v9 = vpop.f32.mrb[46].mxu1  ;;  %v1294_v10 = vpop.f32.mrb[70].mxu0  ;;  %1830 = vmatprep.mubr.bf16.mxu1 %v1464_v58  ;;  %1942 = vmatprep.mubr.bf16.mxu0 %v1466_v59 }
 0x254   : > { %v1164_v11 = vpop.f32.mrb[47].mxu1  ;;  %v1295_v13 = vpop.f32.mrb[71].mxu0  ;;  %1831 = vmatmul.mubr.bf16.gmra.mrb[80].mxu1 %v1463_v4  ;;  %1943 = vmatmul.mubr.bf16.gmra.mrb[104].mxu0 %v1465_v5  ;;  %v1427_v16 = vadd.bf16 %v2990_v61, %v1333_v60  ;;  %v1429_v17 = vadd.bf16 %v2993_v62, %v1335_v63  ;;  %v3085_v61 = vld [vmem:[%s3187_s6] ss:$0 sm:$0xff] }
 0x255   : > { %v1428_v14 = vadd.bf16 %v2996_v24, %v1334_v6  ;;  %v1430_v15 = vadd.bf16 %v2999_v2, %v1336_v7 }
 0x256   : > { %v1467_v19 = vmax.bf16 %v2707_v0, %v1427_v16  ;;  %v1469_v20 = vmax.bf16 %v2707_v0, %v1429_v17 }
 0x257   : > { %v1468_v29 = vmax.bf16 %v2707_v0, %v1428_v14  ;;  %v1470_v18 = vmax.bf16 %v2707_v0, %v1430_v15 }
 0x259   : > { %1838 = vmatprep.mubr.bf16.mxu1 %v1468_v29  ;;  %1950 = vmatprep.mubr.bf16.mxu0 %v1470_v18 }
 0x25c   : > { %1839 = vmatmul.mubr.bf16.gmra.mrb[84].mxu1 %v1467_v19  ;;  %1951 = vmatmul.mubr.bf16.gmra.mrb[108].mxu0 %v1469_v20 }
 0x2e7   : > { %v2226_v24 = vpop.f32.mrb[48].mxu1  ;;  %v2302_v2 = vpop.f32.mrb[72].mxu0 }
 0x2e8   : > { %v2227_v62 = vpop.f32.mrb[49].mxu1  ;;  %v2303_v21 = vpop.f32.mrb[73].mxu0 }
 0x2e9   : > { %v2228_v22 = vadd.f32 %v2227_v62, %v2226_v24  ;;  %v2304_v23 = vadd.f32 %v2303_v21, %v2302_v2  ;;  %v2229_v25 = vpop.f32.mrb[50].mxu1  ;;  %v2305_v26 = vpop.f32.mrb[74].mxu0 }
 0x2ea   : > { %v2230_v27 = vpop.f32.mrb[51].mxu1  ;;  %v2306_v0 = vpop.f32.mrb[75].mxu0 }
 0x2eb   : > { %v1769_v28 = vadd.f32 %v2228_v22, %v3085_v61  ;;  %v2231_v30 = vadd.f32 %v2230_v27, %v2229_v25  ;;  %v2307_v31 = vadd.f32 %v2306_v0, %v2305_v26 }
 0x2ed   : > { %v1881_v32 = vadd.f32 %v2304_v23, %v1769_v28  ;;  %v1772_v34 = vadd.f32 %v2231_v30, %v3085_v61 }
 0x2ef   : > { %1958 = vst [vmem:[%s3091_s16] sm:$0xff] %v1881_v32  ;;  %v1884_v36 = vadd.f32 %v2307_v31, %v1772_v34  ;;  %v2232_v37 = vpop.f32.mrb[52].mxu1  ;;  %v2308_v38 = vpop.f32.mrb[76].mxu0 }
 0x2f0   : > { %v2233_v39 = vpop.f32.mrb[53].mxu1  ;;  %v2309_v40 = vpop.f32.mrb[77].mxu0 }
 0x2f1   : > { %1959 = vst [vmem:[%s3091_s16 + $0x8] sm:$0xff] %v1884_v36  ;;  %v2234_v42 = vadd.f32 %v2233_v39, %v2232_v37  ;;  %v2310_v43 = vadd.f32 %v2309_v40, %v2308_v38  ;;  %v2235_v44 = vpop.f32.mrb[54].mxu1  ;;  %v2311_v41 = vpop.f32.mrb[78].mxu0 }
 0x2f2   : > { %v2236_v33 = vpop.f32.mrb[55].mxu1  ;;  %v2312_v35 = vpop.f32.mrb[79].mxu0 }
 0x2f3   : > { %v1777_v45 = vadd.f32 %v2234_v42, %v3085_v61  ;;  %v2237_v48 = vadd.f32 %v2236_v33, %v2235_v44  ;;  %v2313_v46 = vadd.f32 %v2312_v35, %v2311_v41 }
 0x2f5   : > { %v1889_v47 = vadd.f32 %v2310_v43, %v1777_v45  ;;  %v1780_v53 = vadd.f32 %v2237_v48, %v3085_v61 }
 0x2f7   : > { %1960 = vst [vmem:[%s3091_s16 + $0x10] sm:$0xff] %v1889_v47  ;;  %v1892_v12 = vadd.f32 %v2313_v46, %v1780_v53  ;;  %v2238_v49 = vpop.f32.mrb[56].mxu1  ;;  %v2314_v50 = vpop.f32.mrb[80].mxu0 }
 0x2f8   : > { %v2239_v8 = vpop.f32.mrb[57].mxu1  ;;  %v2315_v51 = vpop.f32.mrb[81].mxu0 }
 0x2f9   : > { %1961 = vst [vmem:[%s3091_s16 + $0x18] sm:$0xff] %v1892_v12  ;;  %v2240_v52 = vadd.f32 %v2239_v8, %v2238_v49  ;;  %v2316_v54 = vadd.f32 %v2315_v51, %v2314_v50  ;;  %v2241_v55 = vpop.f32.mrb[58].mxu1  ;;  %v2317_v56 = vpop.f32.mrb[82].mxu0 }
 0x2fa   : > { %v2242_v57 = vpop.f32.mrb[59].mxu1  ;;  %v2318_v58 = vpop.f32.mrb[83].mxu0 }
 0x2fb   : > { %v1785_v59 = vadd.f32 %v2240_v52, %v3085_v61  ;;  %v2243_v60 = vadd.f32 %v2242_v57, %v2241_v55  ;;  %v2319_v63 = vadd.f32 %v2318_v58, %v2317_v56 }
 0x2fd   : > { %v1897_v1 = vadd.f32 %v2316_v54, %v1785_v59  ;;  %v1788_v3 = vadd.f32 %v2243_v60, %v3085_v61 }
 0x2ff   : > { %1962 = vst [vmem:[%s3091_s16 + $0x20] sm:$0xff] %v1897_v1  ;;  %v1900_v4 = vadd.f32 %v2319_v63, %v1788_v3  ;;  %v2244_v5 = vpop.f32.mrb[60].mxu1  ;;  %v2320_v6 = vpop.f32.mrb[84].mxu0 }
 0x300   : > { %v2245_v7 = vpop.f32.mrb[61].mxu1  ;;  %v2321_v9 = vpop.f32.mrb[85].mxu0 }
 0x301   : > { %1963 = vst [vmem:[%s3091_s16 + $0x28] sm:$0xff] %v1900_v4  ;;  %v2246_v10 = vadd.f32 %v2245_v7, %v2244_v5  ;;  %v2322_v11 = vadd.f32 %v2321_v9, %v2320_v6  ;;  %v2247_v13 = vpop.f32.mrb[62].mxu1  ;;  %v2323_v14 = vpop.f32.mrb[86].mxu0 }
 0x302   : > { %v2248_v15 = vpop.f32.mrb[63].mxu1  ;;  %v2324_v16 = vpop.f32.mrb[87].mxu0 }
 0x303   : > { %v1793_v17 = vadd.f32 %v2246_v10, %v3085_v61  ;;  %v2249_v29 = vadd.f32 %v2248_v15, %v2247_v13  ;;  %v2325_v18 = vadd.f32 %v2324_v16, %v2323_v14 }
 0x305   : > { %v1905_v19 = vadd.f32 %v2322_v11, %v1793_v17  ;;  %v1796_v20 = vadd.f32 %v2249_v29, %v3085_v61 }
 0x307   : > { %1964 = vst [vmem:[%s3091_s16 + $0x30] sm:$0xff] %v1905_v19  ;;  %v1908_v24 = vadd.f32 %v2325_v18, %v1796_v20  ;;  %v2250_v2 = vpop.f32.mrb[64].mxu1  ;;  %v2326_v62 = vpop.f32.mrb[88].mxu0 }
 0x308   : > { %v2251_v21 = vpop.f32.mrb[65].mxu1  ;;  %v2327_v22 = vpop.f32.mrb[89].mxu0 }
 0x309   : > { %1965 = vst [vmem:[%s3091_s16 + $0x38] sm:$0xff] %v1908_v24  ;;  %v2252_v23 = vadd.f32 %v2251_v21, %v2250_v2  ;;  %v2328_v25 = vadd.f32 %v2327_v22, %v2326_v62  ;;  %v2253_v26 = vpop.f32.mrb[66].mxu1  ;;  %v2329_v27 = vpop.f32.mrb[90].mxu0 }
 0x30a   : > { %v2254_v0 = vpop.f32.mrb[67].mxu1  ;;  %v2330_v28 = vpop.f32.mrb[91].mxu0 }
 0x30b   : > { %v1801_v30 = vadd.f32 %v2252_v23, %v3085_v61  ;;  %v2255_v31 = vadd.f32 %v2254_v0, %v2253_v26  ;;  %v2331_v32 = vadd.f32 %v2330_v28, %v2329_v27 }
 0x30d   : > { %v1913_v34 = vadd.f32 %v2328_v25, %v1801_v30  ;;  %v1804_v36 = vadd.f32 %v2255_v31, %v3085_v61 }
 0x30f   : > { %1966 = vst [vmem:[%s3091_s16 + $0x40] sm:$0xff] %v1913_v34  ;;  %v1916_v37 = vadd.f32 %v2331_v32, %v1804_v36  ;;  %v2256_v38 = vpop.f32.mrb[68].mxu1  ;;  %v2332_v39 = vpop.f32.mrb[92].mxu0 }
 0x310   : > { %v2257_v40 = vpop.f32.mrb[69].mxu1  ;;  %v2333_v42 = vpop.f32.mrb[93].mxu0 }
 0x311   : > { %1967 = vst [vmem:[%s3091_s16 + $0x48] sm:$0xff] %v1916_v37  ;;  %v2258_v43 = vadd.f32 %v2257_v40, %v2256_v38  ;;  %v2334_v44 = vadd.f32 %v2333_v42, %v2332_v39  ;;  %v2259_v41 = vpop.f32.mrb[70].mxu1  ;;  %v2335_v33 = vpop.f32.mrb[94].mxu0 }
 0x312   : > { %v2260_v35 = vpop.f32.mrb[71].mxu1  ;;  %v2336_v45 = vpop.f32.mrb[95].mxu0 }
 0x313   : > { %v1809_v48 = vadd.f32 %v2258_v43, %v3085_v61  ;;  %v2261_v46 = vadd.f32 %v2260_v35, %v2259_v41  ;;  %v2337_v47 = vadd.f32 %v2336_v45, %v2335_v33 }
 0x315   : > { %v1921_v53 = vadd.f32 %v2334_v44, %v1809_v48  ;;  %v1812_v12 = vadd.f32 %v2261_v46, %v3085_v61 }
 0x317   : > { %1968 = vst [vmem:[%s3091_s16 + $0x50] sm:$0xff] %v1921_v53  ;;  %v1924_v49 = vadd.f32 %v2337_v47, %v1812_v12  ;;  %v2262_v50 = vpop.f32.mrb[72].mxu1  ;;  %v2338_v8 = vpop.f32.mrb[96].mxu0 }
 0x318   : > { %v2263_v51 = vpop.f32.mrb[73].mxu1  ;;  %v2339_v52 = vpop.f32.mrb[97].mxu0 }
 0x319   : > { %1969 = vst [vmem:[%s3091_s16 + $0x58] sm:$0xff] %v1924_v49  ;;  %v2264_v54 = vadd.f32 %v2263_v51, %v2262_v50  ;;  %v2340_v55 = vadd.f32 %v2339_v52, %v2338_v8  ;;  %v2265_v56 = vpop.f32.mrb[74].mxu1  ;;  %v2341_v57 = vpop.f32.mrb[98].mxu0 }
 0x31a   : > { %v2266_v58 = vpop.f32.mrb[75].mxu1  ;;  %v2342_v59 = vpop.f32.mrb[99].mxu0 }
 0x31b   : > { %v1817_v60 = vadd.f32 %v2264_v54, %v3085_v61  ;;  %v2267_v63 = vadd.f32 %v2266_v58, %v2265_v56  ;;  %v2343_v1 = vadd.f32 %v2342_v59, %v2341_v57 }
 0x31d   : > { %v1929_v3 = vadd.f32 %v2340_v55, %v1817_v60  ;;  %v1820_v4 = vadd.f32 %v2267_v63, %v3085_v61 }
 0x31f   : > { %1970 = vst [vmem:[%s3091_s16 + $0x60] sm:$0xff] %v1929_v3  ;;  %v1932_v5 = vadd.f32 %v2343_v1, %v1820_v4  ;;  %v2268_v6 = vpop.f32.mrb[76].mxu1  ;;  %v2344_v7 = vpop.f32.mrb[100].mxu0 }
 0x320   : > { %v2269_v9 = vpop.f32.mrb[77].mxu1  ;;  %v2345_v10 = vpop.f32.mrb[101].mxu0 }
 0x321   : > { %1971 = vst [vmem:[%s3091_s16 + $0x68] sm:$0xff] %v1932_v5  ;;  %v2270_v11 = vadd.f32 %v2269_v9, %v2268_v6  ;;  %v2346_v13 = vadd.f32 %v2345_v10, %v2344_v7  ;;  %v2271_v14 = vpop.f32.mrb[78].mxu1  ;;  %v2347_v15 = vpop.f32.mrb[102].mxu0 }
 0x322   : > { %v2272_v16 = vpop.f32.mrb[79].mxu1  ;;  %v2348_v17 = vpop.f32.mrb[103].mxu0 }
 0x323   : > { %v1825_v29 = vadd.f32 %v2270_v11, %v3085_v61  ;;  %v2273_v18 = vadd.f32 %v2272_v16, %v2271_v14  ;;  %v2349_v19 = vadd.f32 %v2348_v17, %v2347_v15 }
 0x325   : > { %v1937_v20 = vadd.f32 %v2346_v13, %v1825_v29  ;;  %v1828_v24 = vadd.f32 %v2273_v18, %v3085_v61 }
 0x327   : > { %1972 = vst [vmem:[%s3091_s16 + $0x70] sm:$0xff] %v1937_v20  ;;  %v1940_v2 = vadd.f32 %v2349_v19, %v1828_v24  ;;  %v2274_v62 = vpop.f32.mrb[80].mxu1  ;;  %v2350_v21 = vpop.f32.mrb[104].mxu0 }
 0x328   : > { %v2275_v22 = vpop.f32.mrb[81].mxu1  ;;  %v2351_v23 = vpop.f32.mrb[105].mxu0 }
 0x329   : > { %1973 = vst [vmem:[%s3091_s16 + $0x78] sm:$0xff] %v1940_v2  ;;  %v2276_v25 = vadd.f32 %v2275_v22, %v2274_v62  ;;  %v2352_v26 = vadd.f32 %v2351_v23, %v2350_v21  ;;  %v2277_v27 = vpop.f32.mrb[82].mxu1  ;;  %v2353_v0 = vpop.f32.mrb[106].mxu0 }
 0x32a   : > { %v2278_v28 = vpop.f32.mrb[83].mxu1  ;;  %v2354_v30 = vpop.f32.mrb[107].mxu0 }
 0x32b   : > { %v1833_v31 = vadd.f32 %v2276_v25, %v3085_v61  ;;  %v2279_v32 = vadd.f32 %v2278_v28, %v2277_v27  ;;  %v2355_v34 = vadd.f32 %v2354_v30, %v2353_v0 }
 0x32d   : > { %v1945_v36 = vadd.f32 %v2352_v26, %v1833_v31  ;;  %v1836_v37 = vadd.f32 %v2279_v32, %v3085_v61 }
 0x32f   : > { %1974 = vst [vmem:[%s3091_s16 + $0x80] sm:$0xff] %v1945_v36  ;;  %v1948_v38 = vadd.f32 %v2355_v34, %v1836_v37  ;;  %v2280_v39 = vpop.f32.mrb[84].mxu1  ;;  %v2356_v40 = vpop.f32.mrb[108].mxu0 }
 0x330   : > { %v2281_v42 = vpop.f32.mrb[85].mxu1  ;;  %v2357_v43 = vpop.f32.mrb[109].mxu0 }
 0x331   : > { %1975 = vst [vmem:[%s3091_s16 + $0x88] sm:$0xff] %v1948_v38  ;;  %v2282_v44 = vadd.f32 %v2281_v42, %v2280_v39  ;;  %v2358_v41 = vadd.f32 %v2357_v43, %v2356_v40  ;;  %v2283_v33 = vpop.f32.mrb[86].mxu1  ;;  %v2359_v35 = vpop.f32.mrb[110].mxu0 }
 0x332   : > { %v2284_v45 = vpop.f32.mrb[87].mxu1  ;;  %v2360_v48 = vpop.f32.mrb[111].mxu0 }
 0x333   : > { %v1841_v46 = vadd.f32 %v2282_v44, %v3085_v61 }
 0x335   : > { %v1953_v47 = vadd.f32 %v2358_v41, %v1841_v46 }
 0x337   : > { %1976 = vst [vmem:[%s3091_s16 + $0x90] sm:$0xff] %v1953_v47 }
 0x338   : > { %2642 = shalt.err (!%p2639_p11)
}
 0x339   : > { %s2643_s15 = scalar_lea.hbm %s3133_s22, 2432  ;;  %s2647_s17 = scalar_lea.hbm %s3188_s7, 4864 }
 0x33a   : > { %p2644_p13 = scmp.ne.s32.totalorder %s3133_s22, %s2643_s15  ;;  %p2648_p6 = scmp.lt.u32.totalorder %s3133_s22, %s3188_s7 }
 0x33b   : > { %p2649_p9 = scmp.lt.u32.totalorder %s2647_s17, %s2643_s15  ;;  %p2651_p10 = scmp.lt.u32.totalorder %s2643_s15, %s3133_s22 }
 0x33c   : > { %p2645_p0 = pnand %p2644_p13, %p3202_p1 }
 0x33d   : > { %p2650_p12 = por %p2649_p9, %p2648_p6 }
 0x33e   : > { %p2646_p5 = pneg %p2645_p0 }
 0x33f   : > { %p2652_p2 = por %p2651_p10, %p2650_p12 }
 0x341   : > { %p2653_p3 = pnand %p2652_p2, %p2646_p5 }
 0x343   : > { %2656 = shalt.err (!%p2653_p3)
}
 0x344   : > { %s2710_s13 = smov 128   ;;  %s2711_s20 = smov 8  }
 0x345   : > { %2373 = dma.vmem_to_hbm [thread:$0]  (%p3202_p1), %s3135_s18, 2432, %s3133_s22, %s3140_s28, %s2710_s13, %s2710_s13, %s2711_s20  }
 0x346 PF: > { %p2390_p4 = scmp.ge.s32.totalorder %s2699_s27, 2  ;;  %s2006_s21 = sand.u32 1, %s2687_s24  }
 0x347   : > { %p3203_p7 = scmp.ne.s32.totalorder %s3194_s12, 0  ;;  %s2007_s23 = scalar_lea.sflag [#allocation4], %s2006_s21 }
 0x349   : > { %p2383_p8 = pnand %p2390_p4, %p3203_p7 }
 0x34b   : > { %2682 = dma.done.wait (!%p2383_p8), %s2007_s23, 2432  }
 0x34c   : > { %2684 = vsyncadd (!%p2383_p8), %s2007_s23, 4294964864  ;;  %s3204_s29 = sld [smem:[#allocation11_spill]]  ;;  %p19_p11 = scmp.ge.s32.totalorder %s2777_s30, 4  }
 0x34d   : > { %s3205_s24 = smov %s2691_s25  ;;  %s3206_s25 = smov %s2695_s26 }
 0x34e   : > { %s3208_s27 = smov %s2777_s30  ;;  %21 = sbr.rel (!%p19_p11) target bundleno = 5 (0x5), region = 92 }
 0x352   : > { %s3207_s26 = smov %s3204_s29 }
 0x355   :  { %2012 = vsyncpa [#allocation3], 1 }
 0x356   :  { %2014 = vsyncpa [#allocation3 + $0x1], 1 }
 0x357   :  { %2015 = vsyncpa [#allocation6], 1 }
 0x358   :  { %2016 = vsyncpa [#allocation4], 1 }
 0x359   :  { %2018 = vsyncpa [#allocation4 + $0x1], 1 }

</bundles_post_ra>
